<compile_context>
chip_gen: v5e
topology: v5e:2x2
jax: 0.10.0
libtpu: 0.0.40
codegen_flags: <defaults>
</compile_context>

<pallas_src>
import math
from functools import partial

import jax
import jax.numpy as jnp
from jax.experimental import pallas as pl
from jax.experimental.pallas import tpu as pltpu


def _make_lstm_reg_kernel(Tc, Bp, H, OUT, unroll):
    """Fused 3-layer LSTM + Linear kernel for one sequence chunk of Tc timesteps.

    All chunk tensors are flattened to (Tc*Bp, feat) with Bp a multiple of 8, so row
    offsets t*Bp are sublane-aligned and tiles are dense.
    """

    def sigmoid(v):
        # EUP tanh (free slot next to the MXU push) instead of a VPU divide on the
        # latency-critical recurrence chain.
        return 0.5 * (jnp.tanh(0.5 * v) + 1.0)

    def kernel(x_ref,
               wih0_ref, whh0_ref, b0_ref,
               wih1_ref, whh1_ref, b1_ref,
               wih2_ref, whh2_ref, b2_ref,
               wreg_ref, breg_ref,
               y_ref,
               hs_ref, gx_ref, hcar_ref, ccar_ref):

        # Zero the per-layer (h, c) carries at the first chunk; scratch persists across
        # grid steps, carrying state from chunk to chunk.
        @pl.when(pl.program_id(0) == 0)
        def _():
            hcar_ref[...] = jnp.zeros_like(hcar_ref)
            ccar_ref[...] = jnp.zeros_like(ccar_ref)

        def run_layer(in_ref, wih_ref, whh_ref, b_ref, lidx):
            # Hoisted chunk-wide input projection: one big bf16 MXU matmul, f32 acc.
            # (Full read of in_ref happens here, before any in-place write to hs_ref.)
            gx_ref[...] = (
                jnp.dot(in_ref[...].astype(jnp.bfloat16), wih_ref[...],
                        preferred_element_type=jnp.float32)
                + b_ref[...])

            whh = whh_ref[...]                 # (H, 4H) bf16 — hoisted out of the time loop

            def step(t, carry):
                h, c = carry
                r = pl.multiple_of(t * Bp, Bp)     # sublane-aligned dynamic row offset
                gates = gx_ref[pl.ds(r, Bp), :] + jnp.dot(
                    h.astype(jnp.bfloat16), whh,
                    preferred_element_type=jnp.float32)        # (Bp, 4H) f32
                # TODO(synk): with H not a multiple of 128 (test H=32) these gate slices cut
                # inside one 128-lane vreg; pad H/whh/wih to 128 lanes in production.
                i = sigmoid(gates[:, 0 * H:1 * H])
                f = sigmoid(gates[:, 1 * H:2 * H])
                g = jnp.tanh(gates[:, 2 * H:3 * H])
                o = sigmoid(gates[:, 3 * H:4 * H])
                c_new = f * c + i * g
                h_new = o * jnp.tanh(c_new)
                hs_ref[pl.ds(r, Bp), :] = h_new
                return h_new, c_new

            h0 = hcar_ref[lidx]
            c0 = ccar_ref[lidx]
            # Bounded unroll: keeps adjacent-step overlap visible without exploding vreg
            # live ranges / compile time for long chunks.
            h_out, c_out = jax.lax.fori_loop(0, Tc, step, (h0, c0), unroll=unroll)
            hcar_ref[lidx] = h_out
            ccar_ref[lidx] = c_out

        # TODO(synk): nn.LSTM inter-layer dropout is training-only; inference forward is identity.
        # TODO(synk): layers could be wavefront-interleaved (layer0(t), layer1(t-1), layer2(t-2))
        #             to fill MXU/EUP bubbles on the latency chain; kept sequential for clarity.
        # Layer 0: x -> hs ; Layers 1/2: hs -> hs (in place; chunk projection reads hs fully
        # before the recurrence overwrites it).
        run_layer(x_ref, wih0_ref, whh0_ref, b0_ref, 0)
        run_layer(hs_ref, wih1_ref, whh1_ref, b1_ref, 1)
        run_layer(hs_ref, wih2_ref, whh2_ref, b2_ref, 2)

        # De-fused regression head: one well-shaped (Tc*Bp, H) @ (H, OUT) matmul per chunk,
        # off the recurrence's critical path.
        y_ref[...] = (
            jnp.dot(hs_ref[...].astype(jnp.bfloat16), wreg_ref[...],
                    preferred_element_type=jnp.float32)
            + breg_ref[...])

    return kernel


@partial(jax.jit, static_argnames=("seq_chunk",))
def lstm_reg_forward(x, params, seq_chunk=None):
    S, B, IN = x.shape
    H = params["whh_l0"].shape[1]
    OUT = params["w_reg"].shape[0]
    Bp = ((B + 7) // 8) * 8                    # pad batch to a sublane multiple -> dense (8,*) tiles
    Tc = seq_chunk if seq_chunk is not None else min(S, 32)
    Sp = ((S + Tc - 1) // Tc) * Tc             # pad sequence to a multiple of the chunk
    nchunks = Sp // Tc
    unroll = min(Tc, 8)

    # Pad batch/seq and flatten (Sp, Bp, IN) -> (Sp*Bp, IN) outside the kernel (cheap in XLA).
    # Padded batch rows evolve independently (zero input, zero init state); padded timesteps
    # sit at the end and only affect padded outputs. Both are sliced off below.
    xp = jnp.pad(x, ((0, Sp - S), (0, Bp - B), (0, 0))).reshape(Sp * Bp, IN)

    args = [xp]
    in_specs = [pl.BlockSpec((Tc * Bp, IN), lambda c: (c, 0))]
    for l in range(3):
        wih = params[f"wih_l{l}"].T.astype(jnp.bfloat16)     # (Din, 4H) bf16 for the MXU
        whh = params[f"whh_l{l}"].T.astype(jnp.bfloat16)     # (H, 4H)   bf16 for the MXU
        b = (params[f"bih_l{l}"] + params[f"bhh_l{l}"]).reshape(1, 4 * H).astype(jnp.float32)
        args += [wih, whh, b]
        in_specs += [pl.BlockSpec(wih.shape, lambda c: (0, 0)),
                     pl.BlockSpec(whh.shape, lambda c: (0, 0)),
                     pl.BlockSpec(b.shape, lambda c: (0, 0))]
    wreg = params["w_reg"].T.astype(jnp.bfloat16)            # (H, OUT)
    breg = params["b_reg"].reshape(1, OUT).astype(jnp.float32)
    args += [wreg, breg]
    in_specs += [pl.BlockSpec(wreg.shape, lambda c: (0, 0)),
                 pl.BlockSpec(breg.shape, lambda c: (0, 0))]

    kernel = _make_lstm_reg_kernel(Tc, Bp, H, OUT, unroll)
    # TODO(synk): on v7x, add a leading "parallel" grid axis over batch halves to use both
    #             TensorCores (batch rows are independent).
    y_flat = pl.pallas_call(
        kernel,
        out_shape=jax.ShapeDtypeStruct((Sp * Bp, OUT), jnp.float32),
        grid=(nchunks,),
        in_specs=in_specs,
        out_specs=pl.BlockSpec((Tc * Bp, OUT), lambda c: (c, 0)),
        scratch_shapes=[
            pltpu.VMEM((Tc * Bp, H), jnp.float32),       # hidden-sequence chunk (reused by all layers)
            pltpu.VMEM((Tc * Bp, 4 * H), jnp.float32),   # precomputed gates chunk
            pltpu.VMEM((3, Bp, H), jnp.float32),         # per-layer h carry (persists across chunks)
            pltpu.VMEM((3, Bp, H), jnp.float32),         # per-layer c carry (persists across chunks)
        ],
        compiler_params=pltpu.CompilerParams(
            dimension_semantics=("arbitrary",)),         # chunks are serially dependent
    )(*args)
    return y_flat.reshape(Sp, Bp, OUT)[:S, :B, :]


def lstm_reg_reference(x, params):
    """Pure-JAX f32 reference matching PyTorch nn.LSTM (3 layers) + nn.Linear."""
    h_in = x
    for l in range(3):
        wih = params[f"wih_l{l}"]
        whh = params[f"whh_l{l}"]
        b = params[f"bih_l{l}"] + params[f"bhh_l{l}"]
        B = h_in.shape[1]
        H = whh.shape[1]

        def step(carry, x_t):
            h, c = carry
            gates = x_t @ wih.T + h @ whh.T + b
            i, f, g, o = jnp.split(gates, 4, axis=-1)
            i = jax.nn.sigmoid(i)
            f = jax.nn.sigmoid(f)
            g = jnp.tanh(g)
            o = jax.nn.sigmoid(o)
            c = f * c + i * g
            h = o * jnp.tanh(c)
            return (h, c), h

        init = (jnp.zeros((B, H), jnp.float32), jnp.zeros((B, H), jnp.float32))
        _, hs = jax.lax.scan(step, init, h_in)
        h_in = hs
    S, B, H = h_in.shape
    y = h_in.reshape(S * B, H) @ params["w_reg"].T + params["b_reg"]
    return y.reshape(S, B, -1)


def init_params(key, input_size, hidden_size, output_size=1, num_layers=3):
    """Deterministic synthetic init matching PyTorch shapes: U(-1/sqrt(H), 1/sqrt(H))."""
    assert num_layers == 3
    params = {}
    stdv = 1.0 / math.sqrt(hidden_size)
    keys = jax.random.split(key, num_layers * 4 + 2)
    k_idx = 0
    for l in range(num_layers):
        din = input_size if l == 0 else hidden_size
        params[f"wih_l{l}"] = jax.random.uniform(
            keys[k_idx], (4 * hidden_size, din), jnp.float32, -stdv, stdv); k_idx += 1
        params[f"whh_l{l}"] = jax.random.uniform(
            keys[k_idx], (4 * hidden_size, hidden_size), jnp.float32, -stdv, stdv); k_idx += 1
        params[f"bih_l{l}"] = jax.random.uniform(
            keys[k_idx], (4 * hidden_size,), jnp.float32, -stdv, stdv); k_idx += 1
        params[f"bhh_l{l}"] = jax.random.uniform(
            keys[k_idx], (4 * hidden_size,), jnp.float32, -stdv, stdv); k_idx += 1
    params["w_reg"] = jax.random.uniform(
        keys[k_idx], (output_size, hidden_size), jnp.float32, -stdv, stdv); k_idx += 1
    params["b_reg"] = jax.random.uniform(
        keys[k_idx], (output_size,), jnp.float32, -stdv, stdv)
    return params


if __name__ == "__main__":
    SEQ, BATCH, INPUT, HIDDEN = 8, 2, 4, 32
    key = jax.random.PRNGKey(0)
    kx, kp = jax.random.split(key)
    x = jax.random.normal(kx, (SEQ, BATCH, INPUT), jnp.float32)
    params = init_params(kp, INPUT, HIDDEN, output_size=1, num_layers=3)

    # seq_chunk=4 -> grid=(2,) so the chunked pipeline + cross-chunk carries are exercised.
    y = lstm_reg_forward(x, params, seq_chunk=4)
    y = jax.block_until_ready(y)

    y_ref = lstm_reg_reference(x, params)
    assert y.shape == (SEQ, BATCH, 1), y.shape
    # bf16 MXU operands (f32 accumulation) vs the full-f32 reference: loosened tolerance.
    assert bool(jnp.allclose(y, y_ref, atol=2e-2, rtol=2e-2)), "mismatch vs JAX reference"
    print("KERNEL_OK")
</pallas_src>

<mosaic_0001>
module attributes {stable_mosaic.version = 11 : i64} {
  func.func @kernel(%arg0: i32, %arg1: memref<32x4xf32, #tpu.memory_space<vmem>>, %arg2: memref<4x128xbf16, #tpu.memory_space<vmem>>, %arg3: memref<32x128xbf16, #tpu.memory_space<vmem>>, %arg4: memref<1x128xf32, #tpu.memory_space<vmem>>, %arg5: memref<32x128xbf16, #tpu.memory_space<vmem>>, %arg6: memref<32x128xbf16, #tpu.memory_space<vmem>>, %arg7: memref<1x128xf32, #tpu.memory_space<vmem>>, %arg8: memref<32x128xbf16, #tpu.memory_space<vmem>>, %arg9: memref<32x128xbf16, #tpu.memory_space<vmem>>, %arg10: memref<1x128xf32, #tpu.memory_space<vmem>>, %arg11: memref<32x1xbf16, #tpu.memory_space<vmem>>, %arg12: memref<1x1xf32, #tpu.memory_space<vmem>>, %arg13: memref<32x1xf32, #tpu.memory_space<vmem>>, %arg14: memref<32x32xf32, #tpu.memory_space<vmem>>, %arg15: memref<32x128xf32, #tpu.memory_space<vmem>>, %arg16: memref<3x8x32xf32, #tpu.memory_space<vmem>>, %arg17: memref<3x8x32xf32, #tpu.memory_space<vmem>>) attributes {dimension_semantics = [#tpu.dimension_semantics<arbitrary>], iteration_bounds = array<i64: 2>, scalar_prefetch = 0 : i64, scratch_operands = 4 : i64, tpu.core_type = #tpu.core_type<tc>, window_params = [{transform_indices = @transform_0, window_bounds = array<i64: 32, 4>}, {pipeline_mode = #tpu.pipeline_mode<synchronous>, transform_indices = @transform_1, window_bounds = array<i64: 4, 128>}, {pipeline_mode = #tpu.pipeline_mode<synchronous>, transform_indices = @transform_2, window_bounds = array<i64: 32, 128>}, {pipeline_mode = #tpu.pipeline_mode<synchronous>, transform_indices = @transform_3, window_bounds = array<i64: 1, 128>}, {pipeline_mode = #tpu.pipeline_mode<synchronous>, transform_indices = @transform_4, window_bounds = array<i64: 32, 128>}, {pipeline_mode = #tpu.pipeline_mode<synchronous>, transform_indices = @transform_5, window_bounds = array<i64: 32, 128>}, {pipeline_mode = #tpu.pipeline_mode<synchronous>, transform_indices = @transform_6, window_bounds = array<i64: 1, 128>}, {pipeline_mode = #tpu.pipeline_mode<synchronous>, transform_indices = @transform_7, window_bounds = array<i64: 32, 128>}, {pipeline_mode = #tpu.pipeline_mode<synchronous>, transform_indices = @transform_8, window_bounds = array<i64: 32, 128>}, {pipeline_mode = #tpu.pipeline_mode<synchronous>, transform_indices = @transform_9, window_bounds = array<i64: 1, 128>}, {pipeline_mode = #tpu.pipeline_mode<synchronous>, transform_indices = @transform_10, window_bounds = array<i64: 32, 1>}, {pipeline_mode = #tpu.pipeline_mode<synchronous>, transform_indices = @transform_11, window_bounds = array<i64: 1, 1>}, {transform_indices = @transform_12, window_bounds = array<i64: 32, 1>}]} {
    %c0_i32 = arith.constant 0 : i32
    %0 = arith.cmpi eq, %arg0, %c0_i32 : i32
    %1 = arith.extui %0 : i1 to i32
    %c0_i32_0 = arith.constant 0 : i32
    %2 = arith.cmpi ne, %1, %c0_i32_0 : i32
    scf.if %2 {
      %cst_241 = arith.constant 0.000000e+00 : f32
      %548 = vector.broadcast %cst_241 : f32 to vector<3x8x32xf32>
      %c0_242 = arith.constant 0 : index
      %c0_243 = arith.constant 0 : index
      %c0_244 = arith.constant 0 : index
      %549 = vector.load %arg16[%c0_242, %c0_243, %c0_244] : memref<3x8x32xf32, #tpu.memory_space<vmem>>, vector<3x8x32xf32>
      tpu.vector_store %arg16[%c0_242, %c0_243, %c0_244], %548 {strides = array<i32>} : memref<3x8x32xf32, #tpu.memory_space<vmem>>, vector<3x8x32xf32>,
      %cst_245 = arith.constant 0.000000e+00 : f32
      %550 = vector.broadcast %cst_245 : f32 to vector<3x8x32xf32>
      %c0_246 = arith.constant 0 : index
      %c0_247 = arith.constant 0 : index
      %c0_248 = arith.constant 0 : index
      %551 = vector.load %arg17[%c0_246, %c0_247, %c0_248] : memref<3x8x32xf32, #tpu.memory_space<vmem>>, vector<3x8x32xf32>
      tpu.vector_store %arg17[%c0_246, %c0_247, %c0_248], %550 {strides = array<i32>} : memref<3x8x32xf32, #tpu.memory_space<vmem>>, vector<3x8x32xf32>,
    } else {
    }
    %c0 = arith.constant 0 : index
    %c0_1 = arith.constant 0 : index
    %3 = vector.load %arg1[%c0, %c0_1] : memref<32x4xf32, #tpu.memory_space<vmem>>, vector<32x4xf32>
    %4 = arith.truncf %3 : vector<32x4xf32> to vector<32x4xbf16>
    %c0_2 = arith.constant 0 : index
    %c0_3 = arith.constant 0 : index
    %5 = vector.load %arg2[%c0_2, %c0_3] : memref<4x128xbf16, #tpu.memory_space<vmem>>, vector<4x128xbf16>
    %cst = arith.constant dense<0.000000e+00> : vector<32x128xf32>
    %6 = tpu.matmul %4, %5, %cst {dimension_numbers = #tpu.dot_dimension_numbers<[1], [0], [0], [1], [0, 0, 1, 1], [], []>} : vector<32x4xbf16>, vector<4x128xbf16>, vector<32x128xf32> -> vector<32x128xf32>
    %c0_4 = arith.constant 0 : index
    %c0_5 = arith.constant 0 : index
    %7 = vector.load %arg4[%c0_4, %c0_5] : memref<1x128xf32, #tpu.memory_space<vmem>>, vector<1x128xf32>
    %8 = vector.broadcast %7 : vector<1x128xf32> to vector<32x128xf32>
    %9 = arith.addf %6, %8 : vector<32x128xf32>
    %c0_6 = arith.constant 0 : index
    %c0_7 = arith.constant 0 : index
    %10 = vector.load %arg15[%c0_6, %c0_7] : memref<32x128xf32, #tpu.memory_space<vmem>>, vector<32x128xf32>
    tpu.vector_store %arg15[%c0_6, %c0_7], %9 {strides = array<i32>} : memref<32x128xf32, #tpu.memory_space<vmem>>, vector<32x128xf32>,
    %c0_8 = arith.constant 0 : index
    %c0_9 = arith.constant 0 : index
    %11 = vector.load %arg3[%c0_8, %c0_9] : memref<32x128xbf16, #tpu.memory_space<vmem>>, vector<32x128xbf16>
    %c0_10 = arith.constant 0 : index
    %c0_11 = arith.constant 0 : index
    %c0_12 = arith.constant 0 : index
    %12 = vector.load %arg16[%c0_10, %c0_11, %c0_12] : memref<3x8x32xf32, #tpu.memory_space<vmem>>, vector<1x8x32xf32>
    %13 = vector.shape_cast %12 : vector<1x8x32xf32> to vector<8x32xf32>
    %c0_13 = arith.constant 0 : index
    %c0_14 = arith.constant 0 : index
    %c0_15 = arith.constant 0 : index
    %14 = vector.load %arg17[%c0_13, %c0_14, %c0_15] : memref<3x8x32xf32, #tpu.memory_space<vmem>>, vector<1x8x32xf32>
    %15 = vector.shape_cast %14 : vector<1x8x32xf32> to vector<8x32xf32>
    %c0_i32_16 = arith.constant 0 : i32
    %c8_i32 = arith.constant 8 : i32
    %16 = arith.muli %c0_i32_16, %c8_i32 : i32
    %17 = tpu.assume_multiple %16, 8 : i32
    %18 = arith.index_cast %17 : i32 to index
    %c0_17 = arith.constant 0 : index
    %19 = vector.load %arg15[%18, %c0_17] : memref<32x128xf32, #tpu.memory_space<vmem>>, vector<8x128xf32>
    %20 = arith.truncf %13 : vector<8x32xf32> to vector<8x32xbf16>
    %cst_18 = arith.constant dense<0.000000e+00> : vector<8x128xf32>
    %21 = tpu.matmul %20, %11, %cst_18 {dimension_numbers = #tpu.dot_dimension_numbers<[1], [0], [0], [1], [0, 0, 1, 1], [], []>} : vector<8x32xbf16>, vector<32x128xbf16>, vector<8x128xf32> -> vector<8x128xf32>
    %22 = arith.addf %19, %21 : vector<8x128xf32>
    %23 = vector.extract_strided_slice %22 {offsets = [0, 0], sizes = [8, 32], strides = [1, 1]} : vector<8x128xf32> to vector<8x32xf32>
    %cst_19 = arith.constant 5.000000e-01 : f32
    %24 = vector.broadcast %cst_19 : f32 to vector<8x32xf32>
    %25 = arith.mulf %24, %23 : vector<8x32xf32>
    %26 = math.tanh %25 : vector<8x32xf32>
    %cst_20 = arith.constant 1.000000e+00 : f32
    %27 = vector.broadcast %cst_20 : f32 to vector<8x32xf32>
    %28 = arith.addf %26, %27 : vector<8x32xf32>
    %cst_21 = arith.constant 5.000000e-01 : f32
    %29 = vector.broadcast %cst_21 : f32 to vector<8x32xf32>
    %30 = arith.mulf %29, %28 : vector<8x32xf32>
    %31 = vector.extract_strided_slice %22 {offsets = [0, 32], sizes = [8, 32], strides = [1, 1]} : vector<8x128xf32> to vector<8x32xf32>
    %cst_22 = arith.constant 5.000000e-01 : f32
    %32 = vector.broadcast %cst_22 : f32 to vector<8x32xf32>
    %33 = arith.mulf %32, %31 : vector<8x32xf32>
    %34 = math.tanh %33 : vector<8x32xf32>
    %cst_23 = arith.constant 1.000000e+00 : f32
    %35 = vector.broadcast %cst_23 : f32 to vector<8x32xf32>
    %36 = arith.addf %34, %35 : vector<8x32xf32>
    %cst_24 = arith.constant 5.000000e-01 : f32
    %37 = vector.broadcast %cst_24 : f32 to vector<8x32xf32>
    %38 = arith.mulf %37, %36 : vector<8x32xf32>
    %39 = vector.extract_strided_slice %22 {offsets = [0, 64], sizes = [8, 32], strides = [1, 1]} : vector<8x128xf32> to vector<8x32xf32>
    %40 = math.tanh %39 : vector<8x32xf32>
    %41 = vector.extract_strided_slice %22 {offsets = [0, 96], sizes = [8, 32], strides = [1, 1]} : vector<8x128xf32> to vector<8x32xf32>
    %cst_25 = arith.constant 5.000000e-01 : f32
    %42 = vector.broadcast %cst_25 : f32 to vector<8x32xf32>
    %43 = arith.mulf %42, %41 : vector<8x32xf32>
    %44 = math.tanh %43 : vector<8x32xf32>
    %cst_26 = arith.constant 1.000000e+00 : f32
    %45 = vector.broadcast %cst_26 : f32 to vector<8x32xf32>
    %46 = arith.addf %44, %45 : vector<8x32xf32>
    %cst_27 = arith.constant 5.000000e-01 : f32
    %47 = vector.broadcast %cst_27 : f32 to vector<8x32xf32>
    %48 = arith.mulf %47, %46 : vector<8x32xf32>
    %49 = arith.mulf %38, %15 : vector<8x32xf32>
    %50 = arith.mulf %30, %40 : vector<8x32xf32>
    %51 = arith.addf %49, %50 : vector<8x32xf32>
    %52 = math.tanh %51 : vector<8x32xf32>
    %53 = arith.mulf %48, %52 : vector<8x32xf32>
    %54 = arith.index_cast %17 : i32 to index
    %c0_28 = arith.constant 0 : index
    %55 = vector.load %arg14[%54, %c0_28] : memref<32x32xf32, #tpu.memory_space<vmem>>, vector<8x32xf32>
    tpu.vector_store %arg14[%54, %c0_28], %53 {strides = array<i32>} : memref<32x32xf32, #tpu.memory_space<vmem>>, vector<8x32xf32>,
    %c1_i32 = arith.constant 1 : i32
    %c8_i32_29 = arith.constant 8 : i32
    %56 = arith.muli %c1_i32, %c8_i32_29 : i32
    %57 = tpu.assume_multiple %56, 8 : i32
    %58 = arith.index_cast %57 : i32 to index
    %c0_30 = arith.constant 0 : index
    %59 = vector.load %arg15[%58, %c0_30] : memref<32x128xf32, #tpu.memory_space<vmem>>, vector<8x128xf32>
    %60 = arith.truncf %53 : vector<8x32xf32> to vector<8x32xbf16>
    %cst_31 = arith.constant dense<0.000000e+00> : vector<8x128xf32>
    %61 = tpu.matmul %60, %11, %cst_31 {dimension_numbers = #tpu.dot_dimension_numbers<[1], [0], [0], [1], [0, 0, 1, 1], [], []>} : vector<8x32xbf16>, vector<32x128xbf16>, vector<8x128xf32> -> vector<8x128xf32>
    %62 = arith.addf %59, %61 : vector<8x128xf32>
    %63 = vector.extract_strided_slice %62 {offsets = [0, 0], sizes = [8, 32], strides = [1, 1]} : vector<8x128xf32> to vector<8x32xf32>
    %cst_32 = arith.constant 5.000000e-01 : f32
    %64 = vector.broadcast %cst_32 : f32 to vector<8x32xf32>
    %65 = arith.mulf %64, %63 : vector<8x32xf32>
    %66 = math.tanh %65 : vector<8x32xf32>
    %cst_33 = arith.constant 1.000000e+00 : f32
    %67 = vector.broadcast %cst_33 : f32 to vector<8x32xf32>
    %68 = arith.addf %66, %67 : vector<8x32xf32>
    %cst_34 = arith.constant 5.000000e-01 : f32
    %69 = vector.broadcast %cst_34 : f32 to vector<8x32xf32>
    %70 = arith.mulf %69, %68 : vector<8x32xf32>
    %71 = vector.extract_strided_slice %62 {offsets = [0, 32], sizes = [8, 32], strides = [1, 1]} : vector<8x128xf32> to vector<8x32xf32>
    %cst_35 = arith.constant 5.000000e-01 : f32
    %72 = vector.broadcast %cst_35 : f32 to vector<8x32xf32>
    %73 = arith.mulf %72, %71 : vector<8x32xf32>
    %74 = math.tanh %73 : vector<8x32xf32>
    %cst_36 = arith.constant 1.000000e+00 : f32
    %75 = vector.broadcast %cst_36 : f32 to vector<8x32xf32>
    %76 = arith.addf %74, %75 : vector<8x32xf32>
    %cst_37 = arith.constant 5.000000e-01 : f32
    %77 = vector.broadcast %cst_37 : f32 to vector<8x32xf32>
    %78 = arith.mulf %77, %76 : vector<8x32xf32>
    %79 = vector.extract_strided_slice %62 {offsets = [0, 64], sizes = [8, 32], strides = [1, 1]} : vector<8x128xf32> to vector<8x32xf32>
    %80 = math.tanh %79 : vector<8x32xf32>
    %81 = vector.extract_strided_slice %62 {offsets = [0, 96], sizes = [8, 32], strides = [1, 1]} : vector<8x128xf32> to vector<8x32xf32>
    %cst_38 = arith.constant 5.000000e-01 : f32
    %82 = vector.broadcast %cst_38 : f32 to vector<8x32xf32>
    %83 = arith.mulf %82, %81 : vector<8x32xf32>
    %84 = math.tanh %83 : vector<8x32xf32>
    %cst_39 = arith.constant 1.000000e+00 : f32
    %85 = vector.broadcast %cst_39 : f32 to vector<8x32xf32>
    %86 = arith.addf %84, %85 : vector<8x32xf32>
    %cst_40 = arith.constant 5.000000e-01 : f32
    %87 = vector.broadcast %cst_40 : f32 to vector<8x32xf32>
    %88 = arith.mulf %87, %86 : vector<8x32xf32>
    %89 = arith.mulf %78, %51 : vector<8x32xf32>
    %90 = arith.mulf %70, %80 : vector<8x32xf32>
    %91 = arith.addf %89, %90 : vector<8x32xf32>
    %92 = math.tanh %91 : vector<8x32xf32>
    %93 = arith.mulf %88, %92 : vector<8x32xf32>
    %94 = arith.index_cast %57 : i32 to index
    %c0_41 = arith.constant 0 : index
    %95 = vector.load %arg14[%94, %c0_41] : memref<32x32xf32, #tpu.memory_space<vmem>>, vector<8x32xf32>
    tpu.vector_store %arg14[%94, %c0_41], %93 {strides = array<i32>} : memref<32x32xf32, #tpu.memory_space<vmem>>, vector<8x32xf32>,
    %c2_i32 = arith.constant 2 : i32
    %c8_i32_42 = arith.constant 8 : i32
    %96 = arith.muli %c2_i32, %c8_i32_42 : i32
    %97 = tpu.assume_multiple %96, 8 : i32
    %98 = arith.index_cast %97 : i32 to index
    %c0_43 = arith.constant 0 : index
    %99 = vector.load %arg15[%98, %c0_43] : memref<32x128xf32, #tpu.memory_space<vmem>>, vector<8x128xf32>
    %100 = arith.truncf %93 : vector<8x32xf32> to vector<8x32xbf16>
    %cst_44 = arith.constant dense<0.000000e+00> : vector<8x128xf32>
    %101 = tpu.matmul %100, %11, %cst_44 {dimension_numbers = #tpu.dot_dimension_numbers<[1], [0], [0], [1], [0, 0, 1, 1], [], []>} : vector<8x32xbf16>, vector<32x128xbf16>, vector<8x128xf32> -> vector<8x128xf32>
    %102 = arith.addf %99, %101 : vector<8x128xf32>
    %103 = vector.extract_strided_slice %102 {offsets = [0, 0], sizes = [8, 32], strides = [1, 1]} : vector<8x128xf32> to vector<8x32xf32>
    %cst_45 = arith.constant 5.000000e-01 : f32
    %104 = vector.broadcast %cst_45 : f32 to vector<8x32xf32>
    %105 = arith.mulf %104, %103 : vector<8x32xf32>
    %106 = math.tanh %105 : vector<8x32xf32>
    %cst_46 = arith.constant 1.000000e+00 : f32
    %107 = vector.broadcast %cst_46 : f32 to vector<8x32xf32>
    %108 = arith.addf %106, %107 : vector<8x32xf32>
    %cst_47 = arith.constant 5.000000e-01 : f32
    %109 = vector.broadcast %cst_47 : f32 to vector<8x32xf32>
    %110 = arith.mulf %109, %108 : vector<8x32xf32>
    %111 = vector.extract_strided_slice %102 {offsets = [0, 32], sizes = [8, 32], strides = [1, 1]} : vector<8x128xf32> to vector<8x32xf32>
    %cst_48 = arith.constant 5.000000e-01 : f32
    %112 = vector.broadcast %cst_48 : f32 to vector<8x32xf32>
    %113 = arith.mulf %112, %111 : vector<8x32xf32>
    %114 = math.tanh %113 : vector<8x32xf32>
    %cst_49 = arith.constant 1.000000e+00 : f32
    %115 = vector.broadcast %cst_49 : f32 to vector<8x32xf32>
    %116 = arith.addf %114, %115 : vector<8x32xf32>
    %cst_50 = arith.constant 5.000000e-01 : f32
    %117 = vector.broadcast %cst_50 : f32 to vector<8x32xf32>
    %118 = arith.mulf %117, %116 : vector<8x32xf32>
    %119 = vector.extract_strided_slice %102 {offsets = [0, 64], sizes = [8, 32], strides = [1, 1]} : vector<8x128xf32> to vector<8x32xf32>
    %120 = math.tanh %119 : vector<8x32xf32>
    %121 = vector.extract_strided_slice %102 {offsets = [0, 96], sizes = [8, 32], strides = [1, 1]} : vector<8x128xf32> to vector<8x32xf32>
    %cst_51 = arith.constant 5.000000e-01 : f32
    %122 = vector.broadcast %cst_51 : f32 to vector<8x32xf32>
    %123 = arith.mulf %122, %121 : vector<8x32xf32>
    %124 = math.tanh %123 : vector<8x32xf32>
    %cst_52 = arith.constant 1.000000e+00 : f32
    %125 = vector.broadcast %cst_52 : f32 to vector<8x32xf32>
    %126 = arith.addf %124, %125 : vector<8x32xf32>
    %cst_53 = arith.constant 5.000000e-01 : f32
    %127 = vector.broadcast %cst_53 : f32 to vector<8x32xf32>
    %128 = arith.mulf %127, %126 : vector<8x32xf32>
    %129 = arith.mulf %118, %91 : vector<8x32xf32>
    %130 = arith.mulf %110, %120 : vector<8x32xf32>
    %131 = arith.addf %129, %130 : vector<8x32xf32>
    %132 = math.tanh %131 : vector<8x32xf32>
    %133 = arith.mulf %128, %132 : vector<8x32xf32>
    %134 = arith.index_cast %97 : i32 to index
    %c0_54 = arith.constant 0 : index
    %135 = vector.load %arg14[%134, %c0_54] : memref<32x32xf32, #tpu.memory_space<vmem>>, vector<8x32xf32>
    tpu.vector_store %arg14[%134, %c0_54], %133 {strides = array<i32>} : memref<32x32xf32, #tpu.memory_space<vmem>>, vector<8x32xf32>,
    %c3_i32 = arith.constant 3 : i32
    %c8_i32_55 = arith.constant 8 : i32
    %136 = arith.muli %c3_i32, %c8_i32_55 : i32
    %137 = tpu.assume_multiple %136, 8 : i32
    %138 = arith.index_cast %137 : i32 to index
    %c0_56 = arith.constant 0 : index
    %139 = vector.load %arg15[%138, %c0_56] : memref<32x128xf32, #tpu.memory_space<vmem>>, vector<8x128xf32>
    %140 = arith.truncf %133 : vector<8x32xf32> to vector<8x32xbf16>
    %cst_57 = arith.constant dense<0.000000e+00> : vector<8x128xf32>
    %141 = tpu.matmul %140, %11, %cst_57 {dimension_numbers = #tpu.dot_dimension_numbers<[1], [0], [0], [1], [0, 0, 1, 1], [], []>} : vector<8x32xbf16>, vector<32x128xbf16>, vector<8x128xf32> -> vector<8x128xf32>
    %142 = arith.addf %139, %141 : vector<8x128xf32>
    %143 = vector.extract_strided_slice %142 {offsets = [0, 0], sizes = [8, 32], strides = [1, 1]} : vector<8x128xf32> to vector<8x32xf32>
    %cst_58 = arith.constant 5.000000e-01 : f32
    %144 = vector.broadcast %cst_58 : f32 to vector<8x32xf32>
    %145 = arith.mulf %144, %143 : vector<8x32xf32>
    %146 = math.tanh %145 : vector<8x32xf32>
    %cst_59 = arith.constant 1.000000e+00 : f32
    %147 = vector.broadcast %cst_59 : f32 to vector<8x32xf32>
    %148 = arith.addf %146, %147 : vector<8x32xf32>
    %cst_60 = arith.constant 5.000000e-01 : f32
    %149 = vector.broadcast %cst_60 : f32 to vector<8x32xf32>
    %150 = arith.mulf %149, %148 : vector<8x32xf32>
    %151 = vector.extract_strided_slice %142 {offsets = [0, 32], sizes = [8, 32], strides = [1, 1]} : vector<8x128xf32> to vector<8x32xf32>
    %cst_61 = arith.constant 5.000000e-01 : f32
    %152 = vector.broadcast %cst_61 : f32 to vector<8x32xf32>
    %153 = arith.mulf %152, %151 : vector<8x32xf32>
    %154 = math.tanh %153 : vector<8x32xf32>
    %cst_62 = arith.constant 1.000000e+00 : f32
    %155 = vector.broadcast %cst_62 : f32 to vector<8x32xf32>
    %156 = arith.addf %154, %155 : vector<8x32xf32>
    %cst_63 = arith.constant 5.000000e-01 : f32
    %157 = vector.broadcast %cst_63 : f32 to vector<8x32xf32>
    %158 = arith.mulf %157, %156 : vector<8x32xf32>
    %159 = vector.extract_strided_slice %142 {offsets = [0, 64], sizes = [8, 32], strides = [1, 1]} : vector<8x128xf32> to vector<8x32xf32>
    %160 = math.tanh %159 : vector<8x32xf32>
    %161 = vector.extract_strided_slice %142 {offsets = [0, 96], sizes = [8, 32], strides = [1, 1]} : vector<8x128xf32> to vector<8x32xf32>
    %cst_64 = arith.constant 5.000000e-01 : f32
    %162 = vector.broadcast %cst_64 : f32 to vector<8x32xf32>
    %163 = arith.mulf %162, %161 : vector<8x32xf32>
    %164 = math.tanh %163 : vector<8x32xf32>
    %cst_65 = arith.constant 1.000000e+00 : f32
    %165 = vector.broadcast %cst_65 : f32 to vector<8x32xf32>
    %166 = arith.addf %164, %165 : vector<8x32xf32>
    %cst_66 = arith.constant 5.000000e-01 : f32
    %167 = vector.broadcast %cst_66 : f32 to vector<8x32xf32>
    %168 = arith.mulf %167, %166 : vector<8x32xf32>
    %169 = arith.mulf %158, %131 : vector<8x32xf32>
    %170 = arith.mulf %150, %160 : vector<8x32xf32>
    %171 = arith.addf %169, %170 : vector<8x32xf32>
    %172 = math.tanh %171 : vector<8x32xf32>
    %173 = arith.mulf %168, %172 : vector<8x32xf32>
    %174 = arith.index_cast %137 : i32 to index
    %c0_67 = arith.constant 0 : index
    %175 = vector.load %arg14[%174, %c0_67] : memref<32x32xf32, #tpu.memory_space<vmem>>, vector<8x32xf32>
    tpu.vector_store %arg14[%174, %c0_67], %173 {strides = array<i32>} : memref<32x32xf32, #tpu.memory_space<vmem>>, vector<8x32xf32>,
    %c4_i32 = arith.constant 4 : i32
    %c0_68 = arith.constant 0 : index
    %c0_69 = arith.constant 0 : index
    %c0_70 = arith.constant 0 : index
    %176 = vector.load %arg16[%c0_68, %c0_69, %c0_70] : memref<3x8x32xf32, #tpu.memory_space<vmem>>, vector<1x8x32xf32>
    %177 = vector.shape_cast %176 : vector<1x8x32xf32> to vector<8x32xf32>
    %178 = vector.shape_cast %173 : vector<8x32xf32> to vector<1x8x32xf32>
    tpu.vector_store %arg16[%c0_68, %c0_69, %c0_70], %178 {strides = array<i32>} : memref<3x8x32xf32, #tpu.memory_space<vmem>>, vector<1x8x32xf32>,
    %c0_71 = arith.constant 0 : index
    %c0_72 = arith.constant 0 : index
    %c0_73 = arith.constant 0 : index
    %179 = vector.load %arg17[%c0_71, %c0_72, %c0_73] : memref<3x8x32xf32, #tpu.memory_space<vmem>>, vector<1x8x32xf32>
    %180 = vector.shape_cast %179 : vector<1x8x32xf32> to vector<8x32xf32>
    %181 = vector.shape_cast %171 : vector<8x32xf32> to vector<1x8x32xf32>
    tpu.vector_store %arg17[%c0_71, %c0_72, %c0_73], %181 {strides = array<i32>} : memref<3x8x32xf32, #tpu.memory_space<vmem>>, vector<1x8x32xf32>,
    %c0_74 = arith.constant 0 : index
    %c0_75 = arith.constant 0 : index
    %182 = vector.load %arg14[%c0_74, %c0_75] : memref<32x32xf32, #tpu.memory_space<vmem>>, vector<32x32xf32>
    %183 = arith.truncf %182 : vector<32x32xf32> to vector<32x32xbf16>
    %c0_76 = arith.constant 0 : index
    %c0_77 = arith.constant 0 : index
    %184 = vector.load %arg5[%c0_76, %c0_77] : memref<32x128xbf16, #tpu.memory_space<vmem>>, vector<32x128xbf16>
    %cst_78 = arith.constant dense<0.000000e+00> : vector<32x128xf32>
    %185 = tpu.matmul %183, %184, %cst_78 {dimension_numbers = #tpu.dot_dimension_numbers<[1], [0], [0], [1], [0, 0, 1, 1], [], []>} : vector<32x32xbf16>, vector<32x128xbf16>, vector<32x128xf32> -> vector<32x128xf32>
    %c0_79 = arith.constant 0 : index
    %c0_80 = arith.constant 0 : index
    %186 = vector.load %arg7[%c0_79, %c0_80] : memref<1x128xf32, #tpu.memory_space<vmem>>, vector<1x128xf32>
    %187 = vector.broadcast %186 : vector<1x128xf32> to vector<32x128xf32>
    %188 = arith.addf %185, %187 : vector<32x128xf32>
    %c0_81 = arith.constant 0 : index
    %c0_82 = arith.constant 0 : index
    %189 = vector.load %arg15[%c0_81, %c0_82] : memref<32x128xf32, #tpu.memory_space<vmem>>, vector<32x128xf32>
    tpu.vector_store %arg15[%c0_81, %c0_82], %188 {strides = array<i32>} : memref<32x128xf32, #tpu.memory_space<vmem>>, vector<32x128xf32>,
    %c0_83 = arith.constant 0 : index
    %c0_84 = arith.constant 0 : index
    %190 = vector.load %arg6[%c0_83, %c0_84] : memref<32x128xbf16, #tpu.memory_space<vmem>>, vector<32x128xbf16>
    %c1 = arith.constant 1 : index
    %c0_85 = arith.constant 0 : index
    %c0_86 = arith.constant 0 : index
    %191 = vector.load %arg16[%c1, %c0_85, %c0_86] : memref<3x8x32xf32, #tpu.memory_space<vmem>>, vector<1x8x32xf32>
    %192 = vector.shape_cast %191 : vector<1x8x32xf32> to vector<8x32xf32>
    %c1_87 = arith.constant 1 : index
    %c0_88 = arith.constant 0 : index
    %c0_89 = arith.constant 0 : index
    %193 = vector.load %arg17[%c1_87, %c0_88, %c0_89] : memref<3x8x32xf32, #tpu.memory_space<vmem>>, vector<1x8x32xf32>
    %194 = vector.shape_cast %193 : vector<1x8x32xf32> to vector<8x32xf32>
    %c0_i32_90 = arith.constant 0 : i32
    %c8_i32_91 = arith.constant 8 : i32
    %195 = arith.muli %c0_i32_90, %c8_i32_91 : i32
    %196 = tpu.assume_multiple %195, 8 : i32
    %197 = arith.index_cast %196 : i32 to index
    %c0_92 = arith.constant 0 : index
    %198 = vector.load %arg15[%197, %c0_92] : memref<32x128xf32, #tpu.memory_space<vmem>>, vector<8x128xf32>
    %199 = arith.truncf %192 : vector<8x32xf32> to vector<8x32xbf16>
    %cst_93 = arith.constant dense<0.000000e+00> : vector<8x128xf32>
    %200 = tpu.matmul %199, %190, %cst_93 {dimension_numbers = #tpu.dot_dimension_numbers<[1], [0], [0], [1], [0, 0, 1, 1], [], []>} : vector<8x32xbf16>, vector<32x128xbf16>, vector<8x128xf32> -> vector<8x128xf32>
    %201 = arith.addf %198, %200 : vector<8x128xf32>
    %202 = vector.extract_strided_slice %201 {offsets = [0, 0], sizes = [8, 32], strides = [1, 1]} : vector<8x128xf32> to vector<8x32xf32>
    %cst_94 = arith.constant 5.000000e-01 : f32
    %203 = vector.broadcast %cst_94 : f32 to vector<8x32xf32>
    %204 = arith.mulf %203, %202 : vector<8x32xf32>
    %205 = math.tanh %204 : vector<8x32xf32>
    %cst_95 = arith.constant 1.000000e+00 : f32
    %206 = vector.broadcast %cst_95 : f32 to vector<8x32xf32>
    %207 = arith.addf %205, %206 : vector<8x32xf32>
    %cst_96 = arith.constant 5.000000e-01 : f32
    %208 = vector.broadcast %cst_96 : f32 to vector<8x32xf32>
    %209 = arith.mulf %208, %207 : vector<8x32xf32>
    %210 = vector.extract_strided_slice %201 {offsets = [0, 32], sizes = [8, 32], strides = [1, 1]} : vector<8x128xf32> to vector<8x32xf32>
    %cst_97 = arith.constant 5.000000e-01 : f32
    %211 = vector.broadcast %cst_97 : f32 to vector<8x32xf32>
    %212 = arith.mulf %211, %210 : vector<8x32xf32>
    %213 = math.tanh %212 : vector<8x32xf32>
    %cst_98 = arith.constant 1.000000e+00 : f32
    %214 = vector.broadcast %cst_98 : f32 to vector<8x32xf32>
    %215 = arith.addf %213, %214 : vector<8x32xf32>
    %cst_99 = arith.constant 5.000000e-01 : f32
    %216 = vector.broadcast %cst_99 : f32 to vector<8x32xf32>
    %217 = arith.mulf %216, %215 : vector<8x32xf32>
    %218 = vector.extract_strided_slice %201 {offsets = [0, 64], sizes = [8, 32], strides = [1, 1]} : vector<8x128xf32> to vector<8x32xf32>
    %219 = math.tanh %218 : vector<8x32xf32>
    %220 = vector.extract_strided_slice %201 {offsets = [0, 96], sizes = [8, 32], strides = [1, 1]} : vector<8x128xf32> to vector<8x32xf32>
    %cst_100 = arith.constant 5.000000e-01 : f32
    %221 = vector.broadcast %cst_100 : f32 to vector<8x32xf32>
    %222 = arith.mulf %221, %220 : vector<8x32xf32>
    %223 = math.tanh %222 : vector<8x32xf32>
    %cst_101 = arith.constant 1.000000e+00 : f32
    %224 = vector.broadcast %cst_101 : f32 to vector<8x32xf32>
    %225 = arith.addf %223, %224 : vector<8x32xf32>
    %cst_102 = arith.constant 5.000000e-01 : f32
    %226 = vector.broadcast %cst_102 : f32 to vector<8x32xf32>
    %227 = arith.mulf %226, %225 : vector<8x32xf32>
    %228 = arith.mulf %217, %194 : vector<8x32xf32>
    %229 = arith.mulf %209, %219 : vector<8x32xf32>
    %230 = arith.addf %228, %229 : vector<8x32xf32>
    %231 = math.tanh %230 : vector<8x32xf32>
    %232 = arith.mulf %227, %231 : vector<8x32xf32>
    %233 = arith.index_cast %196 : i32 to index
    %c0_103 = arith.constant 0 : index
    %234 = vector.load %arg14[%233, %c0_103] : memref<32x32xf32, #tpu.memory_space<vmem>>, vector<8x32xf32>
    tpu.vector_store %arg14[%233, %c0_103], %232 {strides = array<i32>} : memref<32x32xf32, #tpu.memory_space<vmem>>, vector<8x32xf32>,
    %c1_i32_104 = arith.constant 1 : i32
    %c8_i32_105 = arith.constant 8 : i32
    %235 = arith.muli %c1_i32_104, %c8_i32_105 : i32
    %236 = tpu.assume_multiple %235, 8 : i32
    %237 = arith.index_cast %236 : i32 to index
    %c0_106 = arith.constant 0 : index
    %238 = vector.load %arg15[%237, %c0_106] : memref<32x128xf32, #tpu.memory_space<vmem>>, vector<8x128xf32>
    %239 = arith.truncf %232 : vector<8x32xf32> to vector<8x32xbf16>
    %cst_107 = arith.constant dense<0.000000e+00> : vector<8x128xf32>
    %240 = tpu.matmul %239, %190, %cst_107 {dimension_numbers = #tpu.dot_dimension_numbers<[1], [0], [0], [1], [0, 0, 1, 1], [], []>} : vector<8x32xbf16>, vector<32x128xbf16>, vector<8x128xf32> -> vector<8x128xf32>
    %241 = arith.addf %238, %240 : vector<8x128xf32>
    %242 = vector.extract_strided_slice %241 {offsets = [0, 0], sizes = [8, 32], strides = [1, 1]} : vector<8x128xf32> to vector<8x32xf32>
    %cst_108 = arith.constant 5.000000e-01 : f32
    %243 = vector.broadcast %cst_108 : f32 to vector<8x32xf32>
    %244 = arith.mulf %243, %242 : vector<8x32xf32>
    %245 = math.tanh %244 : vector<8x32xf32>
    %cst_109 = arith.constant 1.000000e+00 : f32
    %246 = vector.broadcast %cst_109 : f32 to vector<8x32xf32>
    %247 = arith.addf %245, %246 : vector<8x32xf32>
    %cst_110 = arith.constant 5.000000e-01 : f32
    %248 = vector.broadcast %cst_110 : f32 to vector<8x32xf32>
    %249 = arith.mulf %248, %247 : vector<8x32xf32>
    %250 = vector.extract_strided_slice %241 {offsets = [0, 32], sizes = [8, 32], strides = [1, 1]} : vector<8x128xf32> to vector<8x32xf32>
    %cst_111 = arith.constant 5.000000e-01 : f32
    %251 = vector.broadcast %cst_111 : f32 to vector<8x32xf32>
    %252 = arith.mulf %251, %250 : vector<8x32xf32>
    %253 = math.tanh %252 : vector<8x32xf32>
    %cst_112 = arith.constant 1.000000e+00 : f32
    %254 = vector.broadcast %cst_112 : f32 to vector<8x32xf32>
    %255 = arith.addf %253, %254 : vector<8x32xf32>
    %cst_113 = arith.constant 5.000000e-01 : f32
    %256 = vector.broadcast %cst_113 : f32 to vector<8x32xf32>
    %257 = arith.mulf %256, %255 : vector<8x32xf32>
    %258 = vector.extract_strided_slice %241 {offsets = [0, 64], sizes = [8, 32], strides = [1, 1]} : vector<8x128xf32> to vector<8x32xf32>
    %259 = math.tanh %258 : vector<8x32xf32>
    %260 = vector.extract_strided_slice %241 {offsets = [0, 96], sizes = [8, 32], strides = [1, 1]} : vector<8x128xf32> to vector<8x32xf32>
    %cst_114 = arith.constant 5.000000e-01 : f32
    %261 = vector.broadcast %cst_114 : f32 to vector<8x32xf32>
    %262 = arith.mulf %261, %260 : vector<8x32xf32>
    %263 = math.tanh %262 : vector<8x32xf32>
    %cst_115 = arith.constant 1.000000e+00 : f32
    %264 = vector.broadcast %cst_115 : f32 to vector<8x32xf32>
    %265 = arith.addf %263, %264 : vector<8x32xf32>
    %cst_116 = arith.constant 5.000000e-01 : f32
    %266 = vector.broadcast %cst_116 : f32 to vector<8x32xf32>
    %267 = arith.mulf %266, %265 : vector<8x32xf32>
    %268 = arith.mulf %257, %230 : vector<8x32xf32>
    %269 = arith.mulf %249, %259 : vector<8x32xf32>
    %270 = arith.addf %268, %269 : vector<8x32xf32>
    %271 = math.tanh %270 : vector<8x32xf32>
    %272 = arith.mulf %267, %271 : vector<8x32xf32>
    %273 = arith.index_cast %236 : i32 to index
    %c0_117 = arith.constant 0 : index
    %274 = vector.load %arg14[%273, %c0_117] : memref<32x32xf32, #tpu.memory_space<vmem>>, vector<8x32xf32>
    tpu.vector_store %arg14[%273, %c0_117], %272 {strides = array<i32>} : memref<32x32xf32, #tpu.memory_space<vmem>>, vector<8x32xf32>,
    %c2_i32_118 = arith.constant 2 : i32
    %c8_i32_119 = arith.constant 8 : i32
    %275 = arith.muli %c2_i32_118, %c8_i32_119 : i32
    %276 = tpu.assume_multiple %275, 8 : i32
    %277 = arith.index_cast %276 : i32 to index
    %c0_120 = arith.constant 0 : index
    %278 = vector.load %arg15[%277, %c0_120] : memref<32x128xf32, #tpu.memory_space<vmem>>, vector<8x128xf32>
    %279 = arith.truncf %272 : vector<8x32xf32> to vector<8x32xbf16>
    %cst_121 = arith.constant dense<0.000000e+00> : vector<8x128xf32>
    %280 = tpu.matmul %279, %190, %cst_121 {dimension_numbers = #tpu.dot_dimension_numbers<[1], [0], [0], [1], [0, 0, 1, 1], [], []>} : vector<8x32xbf16>, vector<32x128xbf16>, vector<8x128xf32> -> vector<8x128xf32>
    %281 = arith.addf %278, %280 : vector<8x128xf32>
    %282 = vector.extract_strided_slice %281 {offsets = [0, 0], sizes = [8, 32], strides = [1, 1]} : vector<8x128xf32> to vector<8x32xf32>
    %cst_122 = arith.constant 5.000000e-01 : f32
    %283 = vector.broadcast %cst_122 : f32 to vector<8x32xf32>
    %284 = arith.mulf %283, %282 : vector<8x32xf32>
    %285 = math.tanh %284 : vector<8x32xf32>
    %cst_123 = arith.constant 1.000000e+00 : f32
    %286 = vector.broadcast %cst_123 : f32 to vector<8x32xf32>
    %287 = arith.addf %285, %286 : vector<8x32xf32>
    %cst_124 = arith.constant 5.000000e-01 : f32
    %288 = vector.broadcast %cst_124 : f32 to vector<8x32xf32>
    %289 = arith.mulf %288, %287 : vector<8x32xf32>
    %290 = vector.extract_strided_slice %281 {offsets = [0, 32], sizes = [8, 32], strides = [1, 1]} : vector<8x128xf32> to vector<8x32xf32>
    %cst_125 = arith.constant 5.000000e-01 : f32
    %291 = vector.broadcast %cst_125 : f32 to vector<8x32xf32>
    %292 = arith.mulf %291, %290 : vector<8x32xf32>
    %293 = math.tanh %292 : vector<8x32xf32>
    %cst_126 = arith.constant 1.000000e+00 : f32
    %294 = vector.broadcast %cst_126 : f32 to vector<8x32xf32>
    %295 = arith.addf %293, %294 : vector<8x32xf32>
    %cst_127 = arith.constant 5.000000e-01 : f32
    %296 = vector.broadcast %cst_127 : f32 to vector<8x32xf32>
    %297 = arith.mulf %296, %295 : vector<8x32xf32>
    %298 = vector.extract_strided_slice %281 {offsets = [0, 64], sizes = [8, 32], strides = [1, 1]} : vector<8x128xf32> to vector<8x32xf32>
    %299 = math.tanh %298 : vector<8x32xf32>
    %300 = vector.extract_strided_slice %281 {offsets = [0, 96], sizes = [8, 32], strides = [1, 1]} : vector<8x128xf32> to vector<8x32xf32>
    %cst_128 = arith.constant 5.000000e-01 : f32
    %301 = vector.broadcast %cst_128 : f32 to vector<8x32xf32>
    %302 = arith.mulf %301, %300 : vector<8x32xf32>
    %303 = math.tanh %302 : vector<8x32xf32>
    %cst_129 = arith.constant 1.000000e+00 : f32
    %304 = vector.broadcast %cst_129 : f32 to vector<8x32xf32>
    %305 = arith.addf %303, %304 : vector<8x32xf32>
    %cst_130 = arith.constant 5.000000e-01 : f32
    %306 = vector.broadcast %cst_130 : f32 to vector<8x32xf32>
    %307 = arith.mulf %306, %305 : vector<8x32xf32>
    %308 = arith.mulf %297, %270 : vector<8x32xf32>
    %309 = arith.mulf %289, %299 : vector<8x32xf32>
    %310 = arith.addf %308, %309 : vector<8x32xf32>
    %311 = math.tanh %310 : vector<8x32xf32>
    %312 = arith.mulf %307, %311 : vector<8x32xf32>
    %313 = arith.index_cast %276 : i32 to index
    %c0_131 = arith.constant 0 : index
    %314 = vector.load %arg14[%313, %c0_131] : memref<32x32xf32, #tpu.memory_space<vmem>>, vector<8x32xf32>
    tpu.vector_store %arg14[%313, %c0_131], %312 {strides = array<i32>} : memref<32x32xf32, #tpu.memory_space<vmem>>, vector<8x32xf32>,
    %c3_i32_132 = arith.constant 3 : i32
    %c8_i32_133 = arith.constant 8 : i32
    %315 = arith.muli %c3_i32_132, %c8_i32_133 : i32
    %316 = tpu.assume_multiple %315, 8 : i32
    %317 = arith.index_cast %316 : i32 to index
    %c0_134 = arith.constant 0 : index
    %318 = vector.load %arg15[%317, %c0_134] : memref<32x128xf32, #tpu.memory_space<vmem>>, vector<8x128xf32>
    %319 = arith.truncf %312 : vector<8x32xf32> to vector<8x32xbf16>
    %cst_135 = arith.constant dense<0.000000e+00> : vector<8x128xf32>
    %320 = tpu.matmul %319, %190, %cst_135 {dimension_numbers = #tpu.dot_dimension_numbers<[1], [0], [0], [1], [0, 0, 1, 1], [], []>} : vector<8x32xbf16>, vector<32x128xbf16>, vector<8x128xf32> -> vector<8x128xf32>
    %321 = arith.addf %318, %320 : vector<8x128xf32>
    %322 = vector.extract_strided_slice %321 {offsets = [0, 0], sizes = [8, 32], strides = [1, 1]} : vector<8x128xf32> to vector<8x32xf32>
    %cst_136 = arith.constant 5.000000e-01 : f32
    %323 = vector.broadcast %cst_136 : f32 to vector<8x32xf32>
    %324 = arith.mulf %323, %322 : vector<8x32xf32>
    %325 = math.tanh %324 : vector<8x32xf32>
    %cst_137 = arith.constant 1.000000e+00 : f32
    %326 = vector.broadcast %cst_137 : f32 to vector<8x32xf32>
    %327 = arith.addf %325, %326 : vector<8x32xf32>
    %cst_138 = arith.constant 5.000000e-01 : f32
    %328 = vector.broadcast %cst_138 : f32 to vector<8x32xf32>
    %329 = arith.mulf %328, %327 : vector<8x32xf32>
    %330 = vector.extract_strided_slice %321 {offsets = [0, 32], sizes = [8, 32], strides = [1, 1]} : vector<8x128xf32> to vector<8x32xf32>
    %cst_139 = arith.constant 5.000000e-01 : f32
    %331 = vector.broadcast %cst_139 : f32 to vector<8x32xf32>
    %332 = arith.mulf %331, %330 : vector<8x32xf32>
    %333 = math.tanh %332 : vector<8x32xf32>
    %cst_140 = arith.constant 1.000000e+00 : f32
    %334 = vector.broadcast %cst_140 : f32 to vector<8x32xf32>
    %335 = arith.addf %333, %334 : vector<8x32xf32>
    %cst_141 = arith.constant 5.000000e-01 : f32
    %336 = vector.broadcast %cst_141 : f32 to vector<8x32xf32>
    %337 = arith.mulf %336, %335 : vector<8x32xf32>
    %338 = vector.extract_strided_slice %321 {offsets = [0, 64], sizes = [8, 32], strides = [1, 1]} : vector<8x128xf32> to vector<8x32xf32>
    %339 = math.tanh %338 : vector<8x32xf32>
    %340 = vector.extract_strided_slice %321 {offsets = [0, 96], sizes = [8, 32], strides = [1, 1]} : vector<8x128xf32> to vector<8x32xf32>
    %cst_142 = arith.constant 5.000000e-01 : f32
    %341 = vector.broadcast %cst_142 : f32 to vector<8x32xf32>
    %342 = arith.mulf %341, %340 : vector<8x32xf32>
    %343 = math.tanh %342 : vector<8x32xf32>
    %cst_143 = arith.constant 1.000000e+00 : f32
    %344 = vector.broadcast %cst_143 : f32 to vector<8x32xf32>
    %345 = arith.addf %343, %344 : vector<8x32xf32>
    %cst_144 = arith.constant 5.000000e-01 : f32
    %346 = vector.broadcast %cst_144 : f32 to vector<8x32xf32>
    %347 = arith.mulf %346, %345 : vector<8x32xf32>
    %348 = arith.mulf %337, %310 : vector<8x32xf32>
    %349 = arith.mulf %329, %339 : vector<8x32xf32>
    %350 = arith.addf %348, %349 : vector<8x32xf32>
    %351 = math.tanh %350 : vector<8x32xf32>
    %352 = arith.mulf %347, %351 : vector<8x32xf32>
    %353 = arith.index_cast %316 : i32 to index
    %c0_145 = arith.constant 0 : index
    %354 = vector.load %arg14[%353, %c0_145] : memref<32x32xf32, #tpu.memory_space<vmem>>, vector<8x32xf32>
    tpu.vector_store %arg14[%353, %c0_145], %352 {strides = array<i32>} : memref<32x32xf32, #tpu.memory_space<vmem>>, vector<8x32xf32>,
    %c4_i32_146 = arith.constant 4 : i32
    %c1_147 = arith.constant 1 : index
    %c0_148 = arith.constant 0 : index
    %c0_149 = arith.constant 0 : index
    %355 = vector.load %arg16[%c1_147, %c0_148, %c0_149] : memref<3x8x32xf32, #tpu.memory_space<vmem>>, vector<1x8x32xf32>
    %356 = vector.shape_cast %355 : vector<1x8x32xf32> to vector<8x32xf32>
    %357 = vector.shape_cast %352 : vector<8x32xf32> to vector<1x8x32xf32>
    tpu.vector_store %arg16[%c1_147, %c0_148, %c0_149], %357 {strides = array<i32>} : memref<3x8x32xf32, #tpu.memory_space<vmem>>, vector<1x8x32xf32>,
    %c1_150 = arith.constant 1 : index
    %c0_151 = arith.constant 0 : index
    %c0_152 = arith.constant 0 : index
    %358 = vector.load %arg17[%c1_150, %c0_151, %c0_152] : memref<3x8x32xf32, #tpu.memory_space<vmem>>, vector<1x8x32xf32>
    %359 = vector.shape_cast %358 : vector<1x8x32xf32> to vector<8x32xf32>
    %360 = vector.shape_cast %350 : vector<8x32xf32> to vector<1x8x32xf32>
    tpu.vector_store %arg17[%c1_150, %c0_151, %c0_152], %360 {strides = array<i32>} : memref<3x8x32xf32, #tpu.memory_space<vmem>>, vector<1x8x32xf32>,
    %c0_153 = arith.constant 0 : index
    %c0_154 = arith.constant 0 : index
    %361 = vector.load %arg14[%c0_153, %c0_154] : memref<32x32xf32, #tpu.memory_space<vmem>>, vector<32x32xf32>
    %362 = arith.truncf %361 : vector<32x32xf32> to vector<32x32xbf16>
    %c0_155 = arith.constant 0 : index
    %c0_156 = arith.constant 0 : index
    %363 = vector.load %arg8[%c0_155, %c0_156] : memref<32x128xbf16, #tpu.memory_space<vmem>>, vector<32x128xbf16>
    %cst_157 = arith.constant dense<0.000000e+00> : vector<32x128xf32>
    %364 = tpu.matmul %362, %363, %cst_157 {dimension_numbers = #tpu.dot_dimension_numbers<[1], [0], [0], [1], [0, 0, 1, 1], [], []>} : vector<32x32xbf16>, vector<32x128xbf16>, vector<32x128xf32> -> vector<32x128xf32>
    %c0_158 = arith.constant 0 : index
    %c0_159 = arith.constant 0 : index
    %365 = vector.load %arg10[%c0_158, %c0_159] : memref<1x128xf32, #tpu.memory_space<vmem>>, vector<1x128xf32>
    %366 = vector.broadcast %365 : vector<1x128xf32> to vector<32x128xf32>
    %367 = arith.addf %364, %366 : vector<32x128xf32>
    %c0_160 = arith.constant 0 : index
    %c0_161 = arith.constant 0 : index
    %368 = vector.load %arg15[%c0_160, %c0_161] : memref<32x128xf32, #tpu.memory_space<vmem>>, vector<32x128xf32>
    tpu.vector_store %arg15[%c0_160, %c0_161], %367 {strides = array<i32>} : memref<32x128xf32, #tpu.memory_space<vmem>>, vector<32x128xf32>,
    %c0_162 = arith.constant 0 : index
    %c0_163 = arith.constant 0 : index
    %369 = vector.load %arg9[%c0_162, %c0_163] : memref<32x128xbf16, #tpu.memory_space<vmem>>, vector<32x128xbf16>
    %c2 = arith.constant 2 : index
    %c0_164 = arith.constant 0 : index
    %c0_165 = arith.constant 0 : index
    %370 = vector.load %arg16[%c2, %c0_164, %c0_165] : memref<3x8x32xf32, #tpu.memory_space<vmem>>, vector<1x8x32xf32>
    %371 = vector.shape_cast %370 : vector<1x8x32xf32> to vector<8x32xf32>
    %c2_166 = arith.constant 2 : index
    %c0_167 = arith.constant 0 : index
    %c0_168 = arith.constant 0 : index
    %372 = vector.load %arg17[%c2_166, %c0_167, %c0_168] : memref<3x8x32xf32, #tpu.memory_space<vmem>>, vector<1x8x32xf32>
    %373 = vector.shape_cast %372 : vector<1x8x32xf32> to vector<8x32xf32>
    %c0_i32_169 = arith.constant 0 : i32
    %c8_i32_170 = arith.constant 8 : i32
    %374 = arith.muli %c0_i32_169, %c8_i32_170 : i32
    %375 = tpu.assume_multiple %374, 8 : i32
    %376 = arith.index_cast %375 : i32 to index
    %c0_171 = arith.constant 0 : index
    %377 = vector.load %arg15[%376, %c0_171] : memref<32x128xf32, #tpu.memory_space<vmem>>, vector<8x128xf32>
    %378 = arith.truncf %371 : vector<8x32xf32> to vector<8x32xbf16>
    %cst_172 = arith.constant dense<0.000000e+00> : vector<8x128xf32>
    %379 = tpu.matmul %378, %369, %cst_172 {dimension_numbers = #tpu.dot_dimension_numbers<[1], [0], [0], [1], [0, 0, 1, 1], [], []>} : vector<8x32xbf16>, vector<32x128xbf16>, vector<8x128xf32> -> vector<8x128xf32>
    %380 = arith.addf %377, %379 : vector<8x128xf32>
    %381 = vector.extract_strided_slice %380 {offsets = [0, 0], sizes = [8, 32], strides = [1, 1]} : vector<8x128xf32> to vector<8x32xf32>
    %cst_173 = arith.constant 5.000000e-01 : f32
    %382 = vector.broadcast %cst_173 : f32 to vector<8x32xf32>
    %383 = arith.mulf %382, %381 : vector<8x32xf32>
    %384 = math.tanh %383 : vector<8x32xf32>
    %cst_174 = arith.constant 1.000000e+00 : f32
    %385 = vector.broadcast %cst_174 : f32 to vector<8x32xf32>
    %386 = arith.addf %384, %385 : vector<8x32xf32>
    %cst_175 = arith.constant 5.000000e-01 : f32
    %387 = vector.broadcast %cst_175 : f32 to vector<8x32xf32>
    %388 = arith.mulf %387, %386 : vector<8x32xf32>
    %389 = vector.extract_strided_slice %380 {offsets = [0, 32], sizes = [8, 32], strides = [1, 1]} : vector<8x128xf32> to vector<8x32xf32>
    %cst_176 = arith.constant 5.000000e-01 : f32
    %390 = vector.broadcast %cst_176 : f32 to vector<8x32xf32>
    %391 = arith.mulf %390, %389 : vector<8x32xf32>
    %392 = math.tanh %391 : vector<8x32xf32>
    %cst_177 = arith.constant 1.000000e+00 : f32
    %393 = vector.broadcast %cst_177 : f32 to vector<8x32xf32>
    %394 = arith.addf %392, %393 : vector<8x32xf32>
    %cst_178 = arith.constant 5.000000e-01 : f32
    %395 = vector.broadcast %cst_178 : f32 to vector<8x32xf32>
    %396 = arith.mulf %395, %394 : vector<8x32xf32>
    %397 = vector.extract_strided_slice %380 {offsets = [0, 64], sizes = [8, 32], strides = [1, 1]} : vector<8x128xf32> to vector<8x32xf32>
    %398 = math.tanh %397 : vector<8x32xf32>
    %399 = vector.extract_strided_slice %380 {offsets = [0, 96], sizes = [8, 32], strides = [1, 1]} : vector<8x128xf32> to vector<8x32xf32>
    %cst_179 = arith.constant 5.000000e-01 : f32
    %400 = vector.broadcast %cst_179 : f32 to vector<8x32xf32>
    %401 = arith.mulf %400, %399 : vector<8x32xf32>
    %402 = math.tanh %401 : vector<8x32xf32>
    %cst_180 = arith.constant 1.000000e+00 : f32
    %403 = vector.broadcast %cst_180 : f32 to vector<8x32xf32>
    %404 = arith.addf %402, %403 : vector<8x32xf32>
    %cst_181 = arith.constant 5.000000e-01 : f32
    %405 = vector.broadcast %cst_181 : f32 to vector<8x32xf32>
    %406 = arith.mulf %405, %404 : vector<8x32xf32>
    %407 = arith.mulf %396, %373 : vector<8x32xf32>
    %408 = arith.mulf %388, %398 : vector<8x32xf32>
    %409 = arith.addf %407, %408 : vector<8x32xf32>
    %410 = math.tanh %409 : vector<8x32xf32>
    %411 = arith.mulf %406, %410 : vector<8x32xf32>
    %412 = arith.index_cast %375 : i32 to index
    %c0_182 = arith.constant 0 : index
    %413 = vector.load %arg14[%412, %c0_182] : memref<32x32xf32, #tpu.memory_space<vmem>>, vector<8x32xf32>
    tpu.vector_store %arg14[%412, %c0_182], %411 {strides = array<i32>} : memref<32x32xf32, #tpu.memory_space<vmem>>, vector<8x32xf32>,
    %c1_i32_183 = arith.constant 1 : i32
    %c8_i32_184 = arith.constant 8 : i32
    %414 = arith.muli %c1_i32_183, %c8_i32_184 : i32
    %415 = tpu.assume_multiple %414, 8 : i32
    %416 = arith.index_cast %415 : i32 to index
    %c0_185 = arith.constant 0 : index
    %417 = vector.load %arg15[%416, %c0_185] : memref<32x128xf32, #tpu.memory_space<vmem>>, vector<8x128xf32>
    %418 = arith.truncf %411 : vector<8x32xf32> to vector<8x32xbf16>
    %cst_186 = arith.constant dense<0.000000e+00> : vector<8x128xf32>
    %419 = tpu.matmul %418, %369, %cst_186 {dimension_numbers = #tpu.dot_dimension_numbers<[1], [0], [0], [1], [0, 0, 1, 1], [], []>} : vector<8x32xbf16>, vector<32x128xbf16>, vector<8x128xf32> -> vector<8x128xf32>
    %420 = arith.addf %417, %419 : vector<8x128xf32>
    %421 = vector.extract_strided_slice %420 {offsets = [0, 0], sizes = [8, 32], strides = [1, 1]} : vector<8x128xf32> to vector<8x32xf32>
    %cst_187 = arith.constant 5.000000e-01 : f32
    %422 = vector.broadcast %cst_187 : f32 to vector<8x32xf32>
    %423 = arith.mulf %422, %421 : vector<8x32xf32>
    %424 = math.tanh %423 : vector<8x32xf32>
    %cst_188 = arith.constant 1.000000e+00 : f32
    %425 = vector.broadcast %cst_188 : f32 to vector<8x32xf32>
    %426 = arith.addf %424, %425 : vector<8x32xf32>
    %cst_189 = arith.constant 5.000000e-01 : f32
    %427 = vector.broadcast %cst_189 : f32 to vector<8x32xf32>
    %428 = arith.mulf %427, %426 : vector<8x32xf32>
    %429 = vector.extract_strided_slice %420 {offsets = [0, 32], sizes = [8, 32], strides = [1, 1]} : vector<8x128xf32> to vector<8x32xf32>
    %cst_190 = arith.constant 5.000000e-01 : f32
    %430 = vector.broadcast %cst_190 : f32 to vector<8x32xf32>
    %431 = arith.mulf %430, %429 : vector<8x32xf32>
    %432 = math.tanh %431 : vector<8x32xf32>
    %cst_191 = arith.constant 1.000000e+00 : f32
    %433 = vector.broadcast %cst_191 : f32 to vector<8x32xf32>
    %434 = arith.addf %432, %433 : vector<8x32xf32>
    %cst_192 = arith.constant 5.000000e-01 : f32
    %435 = vector.broadcast %cst_192 : f32 to vector<8x32xf32>
    %436 = arith.mulf %435, %434 : vector<8x32xf32>
    %437 = vector.extract_strided_slice %420 {offsets = [0, 64], sizes = [8, 32], strides = [1, 1]} : vector<8x128xf32> to vector<8x32xf32>
    %438 = math.tanh %437 : vector<8x32xf32>
    %439 = vector.extract_strided_slice %420 {offsets = [0, 96], sizes = [8, 32], strides = [1, 1]} : vector<8x128xf32> to vector<8x32xf32>
    %cst_193 = arith.constant 5.000000e-01 : f32
    %440 = vector.broadcast %cst_193 : f32 to vector<8x32xf32>
    %441 = arith.mulf %440, %439 : vector<8x32xf32>
    %442 = math.tanh %441 : vector<8x32xf32>
    %cst_194 = arith.constant 1.000000e+00 : f32
    %443 = vector.broadcast %cst_194 : f32 to vector<8x32xf32>
    %444 = arith.addf %442, %443 : vector<8x32xf32>
    %cst_195 = arith.constant 5.000000e-01 : f32
    %445 = vector.broadcast %cst_195 : f32 to vector<8x32xf32>
    %446 = arith.mulf %445, %444 : vector<8x32xf32>
    %447 = arith.mulf %436, %409 : vector<8x32xf32>
    %448 = arith.mulf %428, %438 : vector<8x32xf32>
    %449 = arith.addf %447, %448 : vector<8x32xf32>
    %450 = math.tanh %449 : vector<8x32xf32>
    %451 = arith.mulf %446, %450 : vector<8x32xf32>
    %452 = arith.index_cast %415 : i32 to index
    %c0_196 = arith.constant 0 : index
    %453 = vector.load %arg14[%452, %c0_196] : memref<32x32xf32, #tpu.memory_space<vmem>>, vector<8x32xf32>
    tpu.vector_store %arg14[%452, %c0_196], %451 {strides = array<i32>} : memref<32x32xf32, #tpu.memory_space<vmem>>, vector<8x32xf32>,
    %c2_i32_197 = arith.constant 2 : i32
    %c8_i32_198 = arith.constant 8 : i32
    %454 = arith.muli %c2_i32_197, %c8_i32_198 : i32
    %455 = tpu.assume_multiple %454, 8 : i32
    %456 = arith.index_cast %455 : i32 to index
    %c0_199 = arith.constant 0 : index
    %457 = vector.load %arg15[%456, %c0_199] : memref<32x128xf32, #tpu.memory_space<vmem>>, vector<8x128xf32>
    %458 = arith.truncf %451 : vector<8x32xf32> to vector<8x32xbf16>
    %cst_200 = arith.constant dense<0.000000e+00> : vector<8x128xf32>
    %459 = tpu.matmul %458, %369, %cst_200 {dimension_numbers = #tpu.dot_dimension_numbers<[1], [0], [0], [1], [0, 0, 1, 1], [], []>} : vector<8x32xbf16>, vector<32x128xbf16>, vector<8x128xf32> -> vector<8x128xf32>
    %460 = arith.addf %457, %459 : vector<8x128xf32>
    %461 = vector.extract_strided_slice %460 {offsets = [0, 0], sizes = [8, 32], strides = [1, 1]} : vector<8x128xf32> to vector<8x32xf32>
    %cst_201 = arith.constant 5.000000e-01 : f32
    %462 = vector.broadcast %cst_201 : f32 to vector<8x32xf32>
    %463 = arith.mulf %462, %461 : vector<8x32xf32>
    %464 = math.tanh %463 : vector<8x32xf32>
    %cst_202 = arith.constant 1.000000e+00 : f32
    %465 = vector.broadcast %cst_202 : f32 to vector<8x32xf32>
    %466 = arith.addf %464, %465 : vector<8x32xf32>
    %cst_203 = arith.constant 5.000000e-01 : f32
    %467 = vector.broadcast %cst_203 : f32 to vector<8x32xf32>
    %468 = arith.mulf %467, %466 : vector<8x32xf32>
    %469 = vector.extract_strided_slice %460 {offsets = [0, 32], sizes = [8, 32], strides = [1, 1]} : vector<8x128xf32> to vector<8x32xf32>
    %cst_204 = arith.constant 5.000000e-01 : f32
    %470 = vector.broadcast %cst_204 : f32 to vector<8x32xf32>
    %471 = arith.mulf %470, %469 : vector<8x32xf32>
    %472 = math.tanh %471 : vector<8x32xf32>
    %cst_205 = arith.constant 1.000000e+00 : f32
    %473 = vector.broadcast %cst_205 : f32 to vector<8x32xf32>
    %474 = arith.addf %472, %473 : vector<8x32xf32>
    %cst_206 = arith.constant 5.000000e-01 : f32
    %475 = vector.broadcast %cst_206 : f32 to vector<8x32xf32>
    %476 = arith.mulf %475, %474 : vector<8x32xf32>
    %477 = vector.extract_strided_slice %460 {offsets = [0, 64], sizes = [8, 32], strides = [1, 1]} : vector<8x128xf32> to vector<8x32xf32>
    %478 = math.tanh %477 : vector<8x32xf32>
    %479 = vector.extract_strided_slice %460 {offsets = [0, 96], sizes = [8, 32], strides = [1, 1]} : vector<8x128xf32> to vector<8x32xf32>
    %cst_207 = arith.constant 5.000000e-01 : f32
    %480 = vector.broadcast %cst_207 : f32 to vector<8x32xf32>
    %481 = arith.mulf %480, %479 : vector<8x32xf32>
    %482 = math.tanh %481 : vector<8x32xf32>
    %cst_208 = arith.constant 1.000000e+00 : f32
    %483 = vector.broadcast %cst_208 : f32 to vector<8x32xf32>
    %484 = arith.addf %482, %483 : vector<8x32xf32>
    %cst_209 = arith.constant 5.000000e-01 : f32
    %485 = vector.broadcast %cst_209 : f32 to vector<8x32xf32>
    %486 = arith.mulf %485, %484 : vector<8x32xf32>
    %487 = arith.mulf %476, %449 : vector<8x32xf32>
    %488 = arith.mulf %468, %478 : vector<8x32xf32>
    %489 = arith.addf %487, %488 : vector<8x32xf32>
    %490 = math.tanh %489 : vector<8x32xf32>
    %491 = arith.mulf %486, %490 : vector<8x32xf32>
    %492 = arith.index_cast %455 : i32 to index
    %c0_210 = arith.constant 0 : index
    %493 = vector.load %arg14[%492, %c0_210] : memref<32x32xf32, #tpu.memory_space<vmem>>, vector<8x32xf32>
    tpu.vector_store %arg14[%492, %c0_210], %491 {strides = array<i32>} : memref<32x32xf32, #tpu.memory_space<vmem>>, vector<8x32xf32>,
    %c3_i32_211 = arith.constant 3 : i32
    %c8_i32_212 = arith.constant 8 : i32
    %494 = arith.muli %c3_i32_211, %c8_i32_212 : i32
    %495 = tpu.assume_multiple %494, 8 : i32
    %496 = arith.index_cast %495 : i32 to index
    %c0_213 = arith.constant 0 : index
    %497 = vector.load %arg15[%496, %c0_213] : memref<32x128xf32, #tpu.memory_space<vmem>>, vector<8x128xf32>
    %498 = arith.truncf %491 : vector<8x32xf32> to vector<8x32xbf16>
    %cst_214 = arith.constant dense<0.000000e+00> : vector<8x128xf32>
    %499 = tpu.matmul %498, %369, %cst_214 {dimension_numbers = #tpu.dot_dimension_numbers<[1], [0], [0], [1], [0, 0, 1, 1], [], []>} : vector<8x32xbf16>, vector<32x128xbf16>, vector<8x128xf32> -> vector<8x128xf32>
    %500 = arith.addf %497, %499 : vector<8x128xf32>
    %501 = vector.extract_strided_slice %500 {offsets = [0, 0], sizes = [8, 32], strides = [1, 1]} : vector<8x128xf32> to vector<8x32xf32>
    %cst_215 = arith.constant 5.000000e-01 : f32
    %502 = vector.broadcast %cst_215 : f32 to vector<8x32xf32>
    %503 = arith.mulf %502, %501 : vector<8x32xf32>
    %504 = math.tanh %503 : vector<8x32xf32>
    %cst_216 = arith.constant 1.000000e+00 : f32
    %505 = vector.broadcast %cst_216 : f32 to vector<8x32xf32>
    %506 = arith.addf %504, %505 : vector<8x32xf32>
    %cst_217 = arith.constant 5.000000e-01 : f32
    %507 = vector.broadcast %cst_217 : f32 to vector<8x32xf32>
    %508 = arith.mulf %507, %506 : vector<8x32xf32>
    %509 = vector.extract_strided_slice %500 {offsets = [0, 32], sizes = [8, 32], strides = [1, 1]} : vector<8x128xf32> to vector<8x32xf32>
    %cst_218 = arith.constant 5.000000e-01 : f32
    %510 = vector.broadcast %cst_218 : f32 to vector<8x32xf32>
    %511 = arith.mulf %510, %509 : vector<8x32xf32>
    %512 = math.tanh %511 : vector<8x32xf32>
    %cst_219 = arith.constant 1.000000e+00 : f32
    %513 = vector.broadcast %cst_219 : f32 to vector<8x32xf32>
    %514 = arith.addf %512, %513 : vector<8x32xf32>
    %cst_220 = arith.constant 5.000000e-01 : f32
    %515 = vector.broadcast %cst_220 : f32 to vector<8x32xf32>
    %516 = arith.mulf %515, %514 : vector<8x32xf32>
    %517 = vector.extract_strided_slice %500 {offsets = [0, 64], sizes = [8, 32], strides = [1, 1]} : vector<8x128xf32> to vector<8x32xf32>
    %518 = math.tanh %517 : vector<8x32xf32>
    %519 = vector.extract_strided_slice %500 {offsets = [0, 96], sizes = [8, 32], strides = [1, 1]} : vector<8x128xf32> to vector<8x32xf32>
    %cst_221 = arith.constant 5.000000e-01 : f32
    %520 = vector.broadcast %cst_221 : f32 to vector<8x32xf32>
    %521 = arith.mulf %520, %519 : vector<8x32xf32>
    %522 = math.tanh %521 : vector<8x32xf32>
    %cst_222 = arith.constant 1.000000e+00 : f32
    %523 = vector.broadcast %cst_222 : f32 to vector<8x32xf32>
    %524 = arith.addf %522, %523 : vector<8x32xf32>
    %cst_223 = arith.constant 5.000000e-01 : f32
    %525 = vector.broadcast %cst_223 : f32 to vector<8x32xf32>
    %526 = arith.mulf %525, %524 : vector<8x32xf32>
    %527 = arith.mulf %516, %489 : vector<8x32xf32>
    %528 = arith.mulf %508, %518 : vector<8x32xf32>
    %529 = arith.addf %527, %528 : vector<8x32xf32>
    %530 = math.tanh %529 : vector<8x32xf32>
    %531 = arith.mulf %526, %530 : vector<8x32xf32>
    %532 = arith.index_cast %495 : i32 to index
    %c0_224 = arith.constant 0 : index
    %533 = vector.load %arg14[%532, %c0_224] : memref<32x32xf32, #tpu.memory_space<vmem>>, vector<8x32xf32>
    tpu.vector_store %arg14[%532, %c0_224], %531 {strides = array<i32>} : memref<32x32xf32, #tpu.memory_space<vmem>>, vector<8x32xf32>,
    %c4_i32_225 = arith.constant 4 : i32
    %c2_226 = arith.constant 2 : index
    %c0_227 = arith.constant 0 : index
    %c0_228 = arith.constant 0 : index
    %534 = vector.load %arg16[%c2_226, %c0_227, %c0_228] : memref<3x8x32xf32, #tpu.memory_space<vmem>>, vector<1x8x32xf32>
    %535 = vector.shape_cast %534 : vector<1x8x32xf32> to vector<8x32xf32>
    %536 = vector.shape_cast %531 : vector<8x32xf32> to vector<1x8x32xf32>
    tpu.vector_store %arg16[%c2_226, %c0_227, %c0_228], %536 {strides = array<i32>} : memref<3x8x32xf32, #tpu.memory_space<vmem>>, vector<1x8x32xf32>,
    %c2_229 = arith.constant 2 : index
    %c0_230 = arith.constant 0 : index
    %c0_231 = arith.constant 0 : index
    %537 = vector.load %arg17[%c2_229, %c0_230, %c0_231] : memref<3x8x32xf32, #tpu.memory_space<vmem>>, vector<1x8x32xf32>
    %538 = vector.shape_cast %537 : vector<1x8x32xf32> to vector<8x32xf32>
    %539 = vector.shape_cast %529 : vector<8x32xf32> to vector<1x8x32xf32>
    tpu.vector_store %arg17[%c2_229, %c0_230, %c0_231], %539 {strides = array<i32>} : memref<3x8x32xf32, #tpu.memory_space<vmem>>, vector<1x8x32xf32>,
    %c0_232 = arith.constant 0 : index
    %c0_233 = arith.constant 0 : index
    %540 = vector.load %arg14[%c0_232, %c0_233] : memref<32x32xf32, #tpu.memory_space<vmem>>, vector<32x32xf32>
    %541 = arith.truncf %540 : vector<32x32xf32> to vector<32x32xbf16>
    %c0_234 = arith.constant 0 : index
    %c0_235 = arith.constant 0 : index
    %542 = vector.load %arg11[%c0_234, %c0_235] : memref<32x1xbf16, #tpu.memory_space<vmem>>, vector<32x1xbf16>
    %cst_236 = arith.constant dense<0.000000e+00> : vector<32x1xf32>
    %543 = tpu.matmul %541, %542, %cst_236 {dimension_numbers = #tpu.dot_dimension_numbers<[1], [0], [0], [1], [0, 0, 1, 1], [], []>} : vector<32x32xbf16>, vector<32x1xbf16>, vector<32x1xf32> -> vector<32x1xf32>
    %c0_237 = arith.constant 0 : index
    %c0_238 = arith.constant 0 : index
    %544 = vector.load %arg12[%c0_237, %c0_238] : memref<1x1xf32, #tpu.memory_space<vmem>>, vector<1x1xf32>
    %545 = vector.broadcast %544 : vector<1x1xf32> to vector<32x1xf32>
    %546 = arith.addf %543, %545 : vector<32x1xf32>
    %c0_239 = arith.constant 0 : index
    %c0_240 = arith.constant 0 : index
    %547 = vector.load %arg13[%c0_239, %c0_240] : memref<32x1xf32, #tpu.memory_space<vmem>>, vector<32x1xf32>
    tpu.vector_store %arg13[%c0_239, %c0_240], %546 {strides = array<i32>} : memref<32x1xf32, #tpu.memory_space<vmem>>, vector<32x1xf32>,
    return
  }
  func.func @transform_0(%arg0: i32) -> (i32, i32) {
    %c0_i32 = arith.constant 0 : i32
    %c0_i32_0 = arith.constant 0 : i32
    return %arg0, %c0_i32 : i32, i32
  }
  func.func @transform_1(%arg0: i32) -> (i32, i32) {
    %c0_i32 = arith.constant 0 : i32
    %c0_i32_0 = arith.constant 0 : i32
    %c0_i32_1 = arith.constant 0 : i32
    return %c0_i32, %c0_i32_0 : i32, i32
  }
  func.func @transform_2(%arg0: i32) -> (i32, i32) {
    %c0_i32 = arith.constant 0 : i32
    %c0_i32_0 = arith.constant 0 : i32
    %c0_i32_1 = arith.constant 0 : i32
    return %c0_i32, %c0_i32_0 : i32, i32
  }
  func.func @transform_3(%arg0: i32) -> (i32, i32) {
    %c0_i32 = arith.constant 0 : i32
    %c0_i32_0 = arith.constant 0 : i32
    %c0_i32_1 = arith.constant 0 : i32
    return %c0_i32, %c0_i32_0 : i32, i32
  }
  func.func @transform_4(%arg0: i32) -> (i32, i32) {
    %c0_i32 = arith.constant 0 : i32
    %c0_i32_0 = arith.constant 0 : i32
    %c0_i32_1 = arith.constant 0 : i32
    return %c0_i32, %c0_i32_0 : i32, i32
  }
  func.func @transform_5(%arg0: i32) -> (i32, i32) {
    %c0_i32 = arith.constant 0 : i32
    %c0_i32_0 = arith.constant 0 : i32
    %c0_i32_1 = arith.constant 0 : i32
    return %c0_i32, %c0_i32_0 : i32, i32
  }
  func.func @transform_6(%arg0: i32) -> (i32, i32) {
    %c0_i32 = arith.constant 0 : i32
    %c0_i32_0 = arith.constant 0 : i32
    %c0_i32_1 = arith.constant 0 : i32
    return %c0_i32, %c0_i32_0 : i32, i32
  }
  func.func @transform_7(%arg0: i32) -> (i32, i32) {
    %c0_i32 = arith.constant 0 : i32
    %c0_i32_0 = arith.constant 0 : i32
    %c0_i32_1 = arith.constant 0 : i32
    return %c0_i32, %c0_i32_0 : i32, i32
  }
  func.func @transform_8(%arg0: i32) -> (i32, i32) {
    %c0_i32 = arith.constant 0 : i32
    %c0_i32_0 = arith.constant 0 : i32
    %c0_i32_1 = arith.constant 0 : i32
    return %c0_i32, %c0_i32_0 : i32, i32
  }
  func.func @transform_9(%arg0: i32) -> (i32, i32) {
    %c0_i32 = arith.constant 0 : i32
    %c0_i32_0 = arith.constant 0 : i32
    %c0_i32_1 = arith.constant 0 : i32
    return %c0_i32, %c0_i32_0 : i32, i32
  }
  func.func @transform_10(%arg0: i32) -> (i32, i32) {
    %c0_i32 = arith.constant 0 : i32
    %c0_i32_0 = arith.constant 0 : i32
    %c0_i32_1 = arith.constant 0 : i32
    return %c0_i32, %c0_i32_0 : i32, i32
  }
  func.func @transform_11(%arg0: i32) -> (i32, i32) {
    %c0_i32 = arith.constant 0 : i32
    %c0_i32_0 = arith.constant 0 : i32
    %c0_i32_1 = arith.constant 0 : i32
    return %c0_i32, %c0_i32_0 : i32, i32
  }
  func.func @transform_12(%arg0: i32) -> (i32, i32) {
    %c0_i32 = arith.constant 0 : i32
    %c0_i32_0 = arith.constant 0 : i32
    return %arg0, %c0_i32 : i32, i32
  }
}

</mosaic_0001>

<bundles_post_ra>
// kernel: lstm_reg_forward.1
= control target key start
LH: loop header
LB: loop body
LE: loop exit
PB: predicated region body
PF: predicated region fallthrough
CT: control target
= control target key end

     0   :  { %s1632_s23 = smov 0   ;;  %s1850_s0 = inlined_call_operand.vmem [shape: f32[64,4], index: 0, kind: input, shape index: {}]   ;;  %s1851_s1 = inlined_call_operand.vmem [shape: bf16[4,128], index: 1, kind: input, shape index: {}]   ;;  %s1852_s2 = inlined_call_operand.vmem [shape: bf16[32,128], index: 2, kind: input, shape index: {}]   ;;  %s1853_s3 = inlined_call_operand.vmem [shape: f32[1,128], index: 3, kind: input, shape index: {}]   ;;  %s1854_s4 = inlined_call_operand.vmem [shape: bf16[32,128], index: 4, kind: input, shape index: {}]   ;;  %s1855_s5 = inlined_call_operand.vmem [shape: bf16[32,128], index: 5, kind: input, shape index: {}]   ;;  %s1856_s6 = inlined_call_operand.vmem [shape: f32[1,128], index: 6, kind: input, shape index: {}]   ;;  %s1857_s7 = inlined_call_operand.vmem [shape: bf16[32,128], index: 7, kind: input, shape index: {}]   ;;  %s1858_s8 = inlined_call_operand.vmem [shape: bf16[32,128], index: 8, kind: input, shape index: {}]   ;;  %s1859_s9 = inlined_call_operand.vmem [shape: f32[1,128], index: 9, kind: input, shape index: {}]   ;;  %s1860_s10 = inlined_call_operand.vmem [shape: bf16[32,1], index: 10, kind: input, shape index: {}]   ;;  %s1861_s11 = inlined_call_operand.<no memory space> [shape: f32[1,1], index: 11, kind: input, shape index: {}]   ;;  %s1862_s12 = inlined_call_operand.vmem [shape: f32[64,1], index: 12, kind: output, shape index: {}]  }
   0x1   :  { %v17_v0 = vstv %s1861_s11 }
   0x2   :  { %18 = vst [vmem:[#allocation6] sm:$0x1] %v17_v0 }
   0x3 LB: > { %s1372_s24 = sadd.s32 4294967295, %s1558_s23   ;;  %p1376_p0 = scmp.ge.s32.totalorder %s1558_s23, 1  ;;  %s1558_s23 = sphi %s1632_s23, %s24_s23  }
   0x4   : > { %p365_p1 = scmp.lt.s32.totalorder %s1558_s23, 3 }
   0x6   : > { %p366_p2 = pnand %p1376_p0, %p365_p1 }
   0x7   : > { %s1377_s25 = sshll.u32 (!%p366_p2), %s1372_s24, 2  ;;  %p1381_p4 = scmp.ne.s32.totalorder (!%p366_p2), %s1372_s24, 0 }
   0x8   : > { %369 = sbr.rel (%p366_p2) target bundleno = 4874 (0x130a), region = 68  ;;  %p408_p3 = scmp.lt.s32.totalorder (!%p366_p2), %s1377_s25, 7 }
   0xd   : > { %s1864_s25 = smov (!%p408_p3, %s1377_s25), 7  ;;  %423 = sbr.rel (%p1381_p4) target bundleno = 25 (0x19), region = 72 }
   0xe   : > { %s1378_s11 = sshll.u32 %s1864_s25, 3 }
   0xf   : > { %s1643_s28 = scalar_lea.vmem %s1850_s0, %s1378_s11  ;;  %s1648_s13 = scalar_lea.vmem %s1862_s12, %s1378_s11 }
  0x12   : > { %vm424_vm0 = vcmask 261120   ;;  %v1560_v1 = vmov 0.0  }
  0x13   : > { %425 = vst.msk [vmem:[#allocation4] sm:$0xff] %vm424_vm0, %v1560_v1 }
  0x14   : > { %426 = vst.msk [vmem:[#allocation4 + $0x8] sm:$0xff] %vm424_vm0, %v1560_v1 }
  0x15   : > { %427 = vst.msk [vmem:[#allocation4 + $0x10] sm:$0xff] %vm424_vm0, %v1560_v1 }
  0x16   : > { %428 = vst.msk [vmem:[#allocation5] sm:$0xff] %vm424_vm0, %v1560_v1 }
  0x17   : > { %429 = vst.msk [vmem:[#allocation5 + $0x8] sm:$0xff] %vm424_vm0, %v1560_v1 }
  0x18   : > { %430 = vst.msk [vmem:[#allocation5 + $0x10] sm:$0xff] %vm424_vm0, %v1560_v1 }
  0x19 PF: > { %v437_v2 = vld [vmem:[%s1851_s1] sm:$0x3]  ;;  %vm449_vm1 = vcmask 1041408   ;;  %v1453_v3 = vld [vmem:[%s1852_s2 + $0x8] sm:$0xff]  ;;  %vm442_vm2 = vcmask 31744   ;;  %vm496_vm3 = vcmask 261120  }
  0x1a   : > { %v431_v4 = vld [vmem:[%s1643_s28] sm:$0xff]  ;;  %v451_v5 = vsel %vm449_vm1, %v437_v2, 0  ;;  %v432_v6 = vld [vmem:[%s1643_s28 + $0x8] sm:$0xff]  ;;  %506 = vmatpush.bf16.msra.mxu1 %v1453_v3  ;;  %560 = vmatpush.bf16.msra.mxu3 %v1453_v3  ;;  %s1561_s22 = smov 64   ;;  %s1562_s24 = smov 32   ;;  %v433_v54 = vld [vmem:[%s1643_s28 + $0x10] sm:$0xff] }
  0x1b   : > { %v1452_v7 = vld [vmem:[%s1852_s2] sm:$0xff]  ;;  %460 = vmatpush.bf16.msra.mxu0 %v451_v5  ;;  %v435_v8 = vpack.c.bf16 %v432_v6, %v431_v4  ;;  %v434_v55 = vld [vmem:[%s1643_s28 + $0x18] sm:$0xff]  ;;  %v1457_v56 = vld [vmem:[%s1855_s5 + $0x8] sm:$0xff]  ;;  %s1563_s30 = smov 96   ;;  %vm1311_vm4 = vcmask 7168  }
  0x1c   : > { %v480_v9 = vld [vmem:[#allocation4] sm:$0xff]  ;;  %v436_v57 = vpack.c.bf16 %v434_v55, %v433_v54  ;;  %v1455_v59 = vld [vmem:[%s1854_s4 + $0x8] sm:$0xff] }
  0x1d   : > { %v483_v10 = vpack.c.bf16 %v480_v9, %v480_v9  ;;  %v1666_v11 = vld [vmem:[%s1853_s3] ss:$0 sm:$0xff]  ;;  %v481_v18 = vld [vmem:[#allocation5] sm:$0xff]  ;;  %742 = vmatpush.bf16.msra.mxu2 %v1455_v59  ;;  %v764_v62 = vld [vmem:[#allocation4 + $0x8] sm:$0xff] }
  0x1e   : > { %1382 = vmatmul.msk.bf16.vlgmr.msra.gmra.mxu0 %vm442_vm2, %v435_v8  ;;  %507 = vmatpush.bf16.msra.mxu1 %v1452_v7  ;;  %v1456_v58 = vld [vmem:[%s1855_s5] sm:$0xff]  ;;  %v768_v63 = vpack.c.bf16 %v764_v62, %v764_v62 }
  0x1f   : > { %561 = vmatpush.bf16.msra.mxu3 %v1452_v7  ;;  %843 = vmatpush.bf16.msrb.mxu0 %v1457_v56  ;;  %v1454_v60 = vld [vmem:[%s1854_s4] sm:$0xff] }
  0x21   : > { %1392 = vmatmul.msk.bf16.vlgmr.msra.gmra.mxu1 %vm496_vm3, %v483_v10  ;;  %743 = vmatpush.bf16.msra.mxu2 %v1454_v60  ;;  %v766_v10 = vld [vmem:[#allocation5 + $0x8] sm:$0xff] }
  0x22   : > { %662 = vmatpush.bf16.msrb.mxu1 %v1453_v3 }
  0x23   : > { %611 = vmatpush.bf16.msrb.mxu3 %v1453_v3  ;;  %844 = vmatpush.bf16.msrb.mxu0 %v1456_v58 }
  0x26   : > { %663 = vmatpush.bf16.msrb.mxu1 %v1452_v7 }
  0x27   : > { %612 = vmatpush.bf16.msrb.mxu3 %v1452_v7 }
  0x2a   : > { %892 = vmatpush.bf16.msra.mxu1 %v1457_v56 }
  0x2e   : > { %1383 = vmatmul.msk.bf16.gmra.mxu0 %vm442_vm2, %v436_v57  ;;  %893 = vmatpush.bf16.msra.mxu1 %v1456_v58 }
  0x9b   : > { %v462_v12 = vpop.f32.mrf.mxu0 }
  0x9c   : > { %v463_v13 = vadd.f32 %v1666_v11, %v462_v12 }
  0x9e   : > { %v509_v14 = vpop.f32.mrf.mxu1 }
  0x9f   : > { %v513_v15 = vadd.f32 %v509_v14, %v463_v13  ;;  %v1711_v14 = vld [vmem:[%s1856_s6] ss:$0 sm:$0xff] }
  0xa1   : > { %1480 = vtanh.f32 %v513_v15  ;;  %v514_v19 = vmul.f32 0.5, %v513_v15 }
  0xa3   : > { %1482 = vtanh.f32 %v514_v19  ;;  %v464_v34 = vpop.f32.mrf.mxu0 }
  0xa4   : > { %v465_v35 = vadd.f32 %v1666_v11, %v464_v34 }
  0xa6   : > { %v511_v16 = vpop.f32.mrf.mxu1 }
  0xa7   : > { %v1481_v17 = vpop.eup %1480 }
  0xa8   : > { %525 = vrot.lane.b32.xlu0 %v1481_v17, %s1561_s22 }
  0xa9   : > { %v1483_v20 = vpop.eup %1482 }
  0xaa   : > { %v516_v21 = vadd.f32 1.0, %v1483_v20 }
  0xab   : > { %v467_v4 = vpop.f32.mrf.mxu0 }
  0xac   : > { %v517_v22 = vmul.f32 0.5, %v516_v21  ;;  %v468_v5 = vadd.f32 %v1666_v11, %v467_v4 }
  0xb0   : > { %520 = vrot.lane.b32.xlu0 %v481_v18, %s1562_s24 }
 0x11a   : > { %v526_v23 = vpop.permute.xlu0 %525 }
 0x11b   : > { %v528_v24 = vmul.f32 %v526_v23, %v517_v22 }
 0x11d   : > { %530 = vrot.lane.b32.xlu1 %v528_v24, %s1562_s24 }
 0x122   : > { %v521_v25 = vpop.permute.xlu0 %520 }
 0x123   : > { %v523_v26 = vmul.f32 %v521_v25, %v517_v22 }
 0x18f   : > { %v531_v27 = vpop.permute.xlu1 %530 }
 0x190   : > { %v533_v28 = vadd.f32 %v531_v27, %v523_v26 }
 0x192   : > { %1484 = vtanh.f32 %v533_v28 }
 0x198   : > { %v1485_v29 = vpop.eup %1484 }
 0x199   : > { %536 = vrot.lane.b32.xlu1 %v1485_v29, %s1561_s22 }
 0x20b   : > { %v537_v30 = vpop.permute.xlu1 %536 }
 0x20c   : > { %v539_v31 = vmul.f32 %v537_v30, %v517_v22 }
 0x20e   : > { %v547_v32 = vpack.c.bf16 %v539_v31, %v539_v31 }
 0x210   : > { %549 = vrot.lane.b32.xlu2 %v547_v32, %s1562_s24 }
 0x26a   : > { %v550_v33 = vpop.permute.xlu2 %549 }
 0x26b   : > { %1393 = vmatmul.msk.bf16.vlgmr.msra.gmra.mxu3 %vm496_vm3, %v550_v33 }
 0x26c   : > { %790 = vmatpush.bf16.msra.mxu3 %v1457_v56 }
 0x270   : > { %791 = vmatpush.bf16.msra.mxu3 %v1456_v58 }
 0x2ee   : > { %v563_v36 = vpop.f32.mrf.mxu3 }
 0x2ef   : > { %v567_v37 = vadd.f32 %v563_v36, %v465_v35 }
 0x2f1   : > { %1486 = vtanh.f32 %v567_v37  ;;  %v568_v40 = vmul.f32 0.5, %v567_v37 }
 0x2f3   : > { %1488 = vtanh.f32 %v568_v40 }
 0x2f6   : > { %v565_v38 = vpop.f32.mrf.mxu3 }
 0x2f7   : > { %v1487_v39 = vpop.eup %1486 }
 0x2f8   : > { %575 = vrot.lane.b32.xlu2 %v1487_v39, %s1561_s22 }
 0x2f9   : > { %v1489_v41 = vpop.eup %1488 }
 0x2fa   : > { %v570_v42 = vadd.f32 1.0, %v1489_v41 }
 0x2fc   : > { %v571_v43 = vmul.f32 0.5, %v570_v42 }
 0x2fe   : > { %v573_v46 = vmul.f32 %v571_v43, %v533_v28 }
 0x352   : > { %v576_v44 = vpop.permute.xlu2 %575 }
 0x353   : > { %v578_v45 = vmul.f32 %v576_v44, %v571_v43 }
 0x355   : > { %580 = vrot.lane.b32.xlu0 %v578_v45, %s1562_s24 }
 0x35d   : > { %541 = vrot.lane.b32.xlu0 %v539_v31, %s1562_s24 }
 0x3c7   : > { %v581_v47 = vpop.permute.xlu0 %580 }
 0x3c8   : > { %v1679_v48 = vadd.f32 %v581_v47, %v573_v46 }
 0x3ca   : > { %1490 = vtanh.f32 %v1679_v48 }
 0x3cf   : > { %v542_v49 = vpop.permute.xlu0 %541 }
 0x3d0   : > { %v1491_v50 = vpop.eup %1490  ;;  %544 = vst.msk [vmem:[#allocation2] sm:$0xff] %vm496_vm3, %v542_v49 }
 0x3d1   : > { %586 = vrot.lane.b32.xlu1 %v1491_v50, %s1561_s22 }
 0x3d7   : > { %v704_v1 = vld [vmem:[#allocation2] sm:$0xff] }
 0x443   : > { %v587_v51 = vpop.permute.xlu1 %586 }
 0x444   : > { %v589_v52 = vmul.f32 %v587_v51, %v571_v43 }
 0x446   : > { %v598_v53 = vpack.c.bf16 %v589_v52, %v589_v52  ;;  %591 = vrot.lane.b32.xlu1 %v589_v52, %s1562_s24 }
 0x448   : > { %600 = vrot.lane.b32.xlu2 %v598_v53, %s1562_s24 }
 0x4a2   : > { %v601_v61 = vpop.permute.xlu2 %600 }
 0x4a3   : > { %1394 = vmatmul.msk.bf16.vlgmr.msrb.gmra.mxu3 %vm496_vm3, %v601_v61 }
 0x4a4   : > { %941 = vmatpush.bf16.msrb.mxu3 %v1457_v56 }
 0x4a8   : > { %942 = vmatpush.bf16.msrb.mxu3 %v1456_v58 }
 0x4b3   : > { %1414 = vmatmul.msk.bf16.vlgmr.msra.gmra.mxu3 %vm496_vm3, %v768_v63 }
 0x4b8   : > { %v592_v0 = vpop.permute.xlu1 %591 }
 0x4b9   : > { %595 = vst.msk [vmem:[#allocation2 + $0x8] sm:$0xff] %vm496_vm3, %v592_v0 }
 0x4c0   : > { %v705_v2 = vld [vmem:[#allocation2 + $0x8] sm:$0xff] }
 0x4c1   : > { %v708_v3 = vpack.c.bf16 %v705_v2, %v704_v1 }
 0x4c3   : > { %1404 = vmatmul.msk.bf16.vlgmr.msra.gmra.mxu2 %vm496_vm3, %v708_v3 }
 0x526   : > { %v614_v6 = vpop.f32.mrf.mxu3 }
 0x527   : > { %v618_v7 = vadd.f32 %v614_v6, %v468_v5 }
 0x529   : > { %1492 = vtanh.f32 %v618_v7  ;;  %v619_v19 = vmul.f32 0.5, %v618_v7 }
 0x52e   : > { %v616_v8 = vpop.f32.mrf.mxu3 }
 0x52f   : > { %v1493_v9 = vpop.eup %1492 }
 0x530   : > { %626 = vrot.lane.b32.xlu2 %v1493_v9, %s1561_s22 }
 0x536   : > { %v793_v12 = vpop.f32.mrf.mxu3 }
 0x538   : > { %804 = vrot.lane.b32.xlu2 %v766_v10, %s1562_s24 }
 0x53e   : > { %v795_v13 = vpop.f32.mrf.mxu3 }
 0x546   : > { %v745_v15 = vpop.f32.mrf.mxu2 }
 0x547   : > { %v746_v16 = vadd.f32 %v1711_v14, %v745_v15 }
 0x549   : > { %v797_v17 = vadd.f32 %v793_v12, %v746_v16 }
 0x54b   : > { %1494 = vtanh.f32 %v797_v17  ;;  %v798_v25 = vmul.f32 0.5, %v797_v17 }
 0x54c   : > { %1496 = vtanh.f32 %v619_v19 }
 0x54d   : > { %1498 = vtanh.f32 %v798_v25  ;;  %v1459_v25 = vld [vmem:[%s1857_s7 + $0x8] sm:$0xff] }
 0x54e   : > { %v747_v54 = vpop.f32.mrf.mxu2  ;;  %1020 = vmatpush.bf16.msra.mxu0 %v1459_v25 }
 0x54f   : > { %v748_v55 = vadd.f32 %v1711_v14, %v747_v54 }
 0x551   : > { %v1495_v18 = vpop.eup %1494 }
 0x552   : > { %809 = vrot.lane.b32.xlu0 %v1495_v18, %s1561_s22  ;;  %v1497_v20 = vpop.eup %1496 }
 0x553   : > { %v621_v21 = vadd.f32 1.0, %v1497_v20  ;;  %v1499_v26 = vpop.eup %1498 }
 0x554   : > { %v800_v27 = vadd.f32 1.0, %v1499_v26  ;;  %v1461_v26 = vld [vmem:[%s1858_s8 + $0x8] sm:$0xff] }
 0x555   : > { %v622_v22 = vmul.f32 0.5, %v621_v21  ;;  %1121 = vmatpush.bf16.msrb.mxu2 %v1461_v26  ;;  %1170 = vmatpush.bf16.msra.mxu3 %v1461_v26 }
 0x556   : > { %v801_v28 = vmul.f32 0.5, %v800_v27  ;;  %v1458_v27 = vld [vmem:[%s1857_s7] sm:$0xff] }
 0x557   : > { %v624_v31 = vmul.f32 %v622_v22, %v1679_v48  ;;  %v469_v48 = vpop.f32.mrf.mxu0  ;;  %1021 = vmatpush.bf16.msra.mxu0 %v1458_v27 }
 0x558   : > { %v470_v49 = vadd.f32 %v1666_v11, %v469_v48  ;;  %v1044_v48 = vld [vmem:[#allocation5 + $0x10] sm:$0xff] }
 0x58a   : > { %v627_v23 = vpop.permute.xlu2 %626 }
 0x58b   : > { %v629_v24 = vmul.f32 %v627_v23, %v622_v22 }
 0x58d   : > { %631 = vrot.lane.b32.xlu1 %v629_v24, %s1562_s24 }
 0x592   : > { %v805_v35 = vpop.permute.xlu2 %804 }
 0x593   : > { %v807_v36 = vmul.f32 %v805_v35, %v801_v28 }
 0x5c4   : > { %v810_v29 = vpop.permute.xlu0 %809 }
 0x5c5   : > { %v812_v30 = vmul.f32 %v810_v29, %v801_v28 }
 0x5c7   : > { %814 = vrot.lane.b32.xlu0 %v812_v30, %s1562_s24 }
 0x5ff   : > { %v632_v32 = vpop.permute.xlu1 %631 }
 0x600   : > { %v634_v33 = vadd.f32 %v632_v32, %v624_v31  ;;  %v1460_v31 = vld [vmem:[%s1858_s8] sm:$0xff] }
 0x601   : > { %1122 = vmatpush.bf16.msrb.mxu2 %v1460_v31  ;;  %1171 = vmatpush.bf16.msra.mxu3 %v1460_v31 }
 0x602   : > { %1500 = vtanh.f32 %v634_v33 }
 0x608   : > { %v1501_v34 = vpop.eup %1500 }
 0x609   : > { %637 = vrot.lane.b32.xlu1 %v1501_v34, %s1561_s22 }
 0x639   : > { %v815_v37 = vpop.permute.xlu0 %814 }
 0x63a   : > { %v817_v38 = vadd.f32 %v815_v37, %v807_v36  ;;  %v1042_v37 = vld [vmem:[#allocation4 + $0x10] sm:$0xff] }
 0x63c   : > { %1502 = vtanh.f32 %v817_v38 }
 0x642   : > { %v1503_v39 = vpop.eup %1502 }
 0x643   : > { %820 = vrot.lane.b32.xlu2 %v1503_v39, %s1561_s22 }
 0x67b   : > { %v638_v40 = vpop.permute.xlu1 %637 }
 0x67c   : > { %v640_v41 = vmul.f32 %v638_v40, %v622_v22 }
 0x67e   : > { %v649_v42 = vpack.c.bf16 %v640_v41, %v640_v41 }
 0x680   : > { %651 = vrot.lane.b32.xlu0 %v649_v42, %s1562_s24 }
 0x69d   : > { %v821_v43 = vpop.permute.xlu2 %820 }
 0x69e   : > { %v823_v44 = vmul.f32 %v821_v43, %v801_v28 }
 0x6a0   : > { %v830_v45 = vpack.c.bf16 %v823_v44, %v823_v44 }
 0x6a2   : > { %832 = vrot.lane.b32.xlu1 %v830_v45, %s1562_s24  ;;  %v1769_v45 = vld [vmem:[%s1859_s9] ss:$0 sm:$0xff] }
 0x6f2   : > { %v652_v46 = vpop.permute.xlu0 %651 }
 0x6f3   : > { %1395 = vmatmul.msk.bf16.vlgmr.msrb.gmra.mxu1 %vm496_vm3, %v652_v46 }
 0x6f4   : > { %1068 = vmatpush.bf16.msrb.mxu1 %v1461_v26 }
 0x6f8   : > { %1069 = vmatpush.bf16.msrb.mxu1 %v1460_v31 }
 0x714   : > { %v833_v47 = vpop.permute.xlu1 %832 }
 0x715   : > { %1415 = vmatmul.msk.bf16.vlgmr.msrb.gmra.mxu0 %vm496_vm3, %v833_v47 }
 0x770   : > { %v665_v50 = vpop.f32.mrf.mxu1 }
 0x771   : > { %v669_v51 = vadd.f32 %v665_v50, %v470_v49 }
 0x773   : > { %1504 = vtanh.f32 %v669_v51  ;;  %v670_v60 = vmul.f32 0.5, %v669_v51 }
 0x778   : > { %v667_v52 = vpop.f32.mrf.mxu1 }
 0x779   : > { %v1505_v53 = vpop.eup %1504 }
 0x77a   : > { %677 = vrot.lane.b32.xlu2 %v1505_v53, %s1561_s22 }
 0x792   : > { %v846_v56 = vpop.f32.mrf.mxu0 }
 0x793   : > { %v850_v57 = vadd.f32 %v846_v56, %v748_v55 }
 0x795   : > { %1506 = vtanh.f32 %v850_v57  ;;  %v851_v1 = vmul.f32 0.5, %v850_v57 }
 0x796   : > { %1508 = vtanh.f32 %v670_v60 }
 0x797   : > { %1510 = vtanh.f32 %v851_v1 }
 0x79a   : > { %v848_v58 = vpop.f32.mrf.mxu0 }
 0x79b   : > { %v1507_v59 = vpop.eup %1506 }
 0x79c   : > { %858 = vrot.lane.b32.xlu0 %v1507_v59, %s1561_s22  ;;  %v1509_v11 = vpop.eup %1508 }
 0x79d   : > { %v672_v61 = vadd.f32 1.0, %v1509_v11  ;;  %v1511_v2 = vpop.eup %1510 }
 0x79e   : > { %v853_v3 = vadd.f32 1.0, %v1511_v2 }
 0x79f   : > { %v673_v62 = vmul.f32 0.5, %v672_v61 }
 0x7a0   : > { %v854_v4 = vmul.f32 0.5, %v853_v3 }
 0x7a1   : > { %v675_v7 = vmul.f32 %v673_v62, %v634_v33 }
 0x7a2   : > { %v856_v12 = vmul.f32 %v854_v4, %v817_v38  ;;  %v1046_v38 = vpack.c.bf16 %v1042_v37, %v1042_v37 }
 0x7d4   : > { %v678_v63 = vpop.permute.xlu2 %677 }
 0x7d5   : > { %v680_v0 = vmul.f32 %v678_v63, %v673_v62 }
 0x7d7   : > { %682 = vrot.lane.b32.xlu1 %v680_v0, %s1562_s24 }
 0x80e   : > { %v859_v5 = vpop.permute.xlu0 %858 }
 0x80f   : > { %v861_v6 = vmul.f32 %v859_v5, %v854_v4 }
 0x811   : > { %863 = vrot.lane.b32.xlu2 %v861_v6, %s1562_s24 }
 0x819   : > { %642 = vrot.lane.b32.xlu2 %v640_v41, %s1562_s24 }
 0x821   : > { %825 = vrot.lane.b32.xlu2 %v823_v44, %s1562_s24 }
 0x849   : > { %v683_v8 = vpop.permute.xlu1 %682 }
 0x84a   : > { %v1732_v9 = vadd.f32 %v683_v8, %v675_v7 }
 0x84c   : > { %1512 = vtanh.f32 %v1732_v9 }
 0x852   : > { %v1513_v10 = vpop.eup %1512 }
 0x853   : > { %688 = vrot.lane.b32.xlu0 %v1513_v10, %s1561_s22 }
 0x86b   : > { %v864_v13 = vpop.permute.xlu2 %863 }
 0x86c   : > { %v1736_v15 = vadd.f32 %v864_v13, %v856_v12 }
 0x86e   : > { %1514 = vtanh.f32 %v1736_v15 }
 0x873   : > { %v643_v16 = vpop.permute.xlu2 %642 }
 0x874   : > { %v1515_v17 = vpop.eup %1514  ;;  %646 = vst.msk [vmem:[#allocation2 + $0x10] sm:$0xff] %vm496_vm3, %v643_v16 }
 0x875   : > { %869 = vrot.lane.b32.xlu1 %v1515_v17, %s1561_s22 }
 0x87b   : > { %v826_v18 = vpop.permute.xlu2 %825  ;;  %v706_v28 = vld [vmem:[#allocation2 + $0x10] sm:$0xff] }
 0x87c   : > { %828 = vst.msk [vmem:[#allocation2] sm:$0xff] %vm496_vm3, %v826_v18 }
 0x883   : > { %v982_v34 = vld [vmem:[#allocation2] sm:$0xff] }
 0x8c5   : > { %v689_v19 = vpop.permute.xlu0 %688 }
 0x8c6   : > { %v691_v20 = vmul.f32 %v689_v19, %v673_v62 }
 0x8c8   : > { %693 = vrot.lane.b32.xlu0 %v691_v20, %s1562_s24 }
 0x8e7   : > { %v870_v21 = vpop.permute.xlu1 %869 }
 0x8e8   : > { %v872_v22 = vmul.f32 %v870_v21, %v854_v4 }
 0x8ea   : > { %v879_v23 = vpack.c.bf16 %v872_v22, %v872_v22  ;;  %874 = vrot.lane.b32.xlu0 %v872_v22, %s1562_s24 }
 0x8ec   : > { %881 = vrot.lane.b32.xlu1 %v879_v23, %s1562_s24 }
 0x93a   : > { %v694_v24 = vpop.permute.xlu0 %693 }
 0x93b   : > { %697 = vst.msk [vmem:[#allocation2 + $0x18] sm:$0xff] %vm496_vm3, %v694_v24 }
 0x93c   : > { %698 = vst.msk [vmem:[#allocation4] sm:$0xff] %vm496_vm3, %v694_v24 }
 0x942   : > { %v707_v29 = vld [vmem:[#allocation2 + $0x18] sm:$0xff] }
 0x943   : > { %v709_v30 = vpack.c.bf16 %v707_v29, %v706_v28 }
 0x945   : > { %1405 = vmatmul.msk.bf16.gmra.mxu2 %vm496_vm3, %v709_v30 }
 0x95c   : > { %v875_v32 = vpop.permute.xlu0 %874 }
 0x95d   : > { %877 = vst.msk [vmem:[#allocation2 + $0x8] sm:$0xff] %vm496_vm3, %v875_v32 }
 0x95e   : > { %v882_v33 = vpop.permute.xlu1 %881 }
 0x95f   : > { %1416 = vmatmul.msk.bf16.vlgmr.msra.gmra.mxu1 %vm496_vm3, %v882_v33 }
 0x960   : > { %1219 = vmatpush.bf16.msra.mxu1 %v1461_v26 }
 0x964   : > { %v983_v35 = vld [vmem:[#allocation2 + $0x8] sm:$0xff]  ;;  %1220 = vmatpush.bf16.msra.mxu1 %v1460_v31 }
 0x965   : > { %v986_v36 = vpack.c.bf16 %v983_v35, %v982_v34 }
 0x967   : > { %1426 = vmatmul.msk.bf16.vlgmr.msra.gmra.mxu0 %vm496_vm3, %v986_v36 }
 0x96f   : > { %1436 = vmatmul.msk.bf16.vlgmr.msrb.gmra.mxu1 %vm496_vm3, %v1046_v38 }
 0x9c8   : > { %v750_v39 = vpop.f32.mrf.mxu2 }
 0x9c9   : > { %v751_v40 = vadd.f32 %v1711_v14, %v750_v39 }
 0x9d0   : > { %v752_v20 = vpop.f32.mrf.mxu2 }
 0x9d1   : > { %v753_v25 = vadd.f32 %v1711_v14, %v752_v20 }
 0x9dc   : > { %v895_v41 = vpop.f32.mrf.mxu1 }
 0x9dd   : > { %v899_v42 = vadd.f32 %v895_v41, %v751_v40 }
 0x9df   : > { %1516 = vtanh.f32 %v899_v42  ;;  %v900_v54 = vmul.f32 0.5, %v899_v42 }
 0x9e4   : > { %v897_v43 = vpop.f32.mrf.mxu1  ;;  %v1023_v46 = vpop.f32.mrf.mxu0 }
 0x9e5   : > { %v1517_v44 = vpop.eup %1516  ;;  %v1024_v47 = vadd.f32 %v1769_v45, %v1023_v46 }
 0x9e6   : > { %907 = vrot.lane.b32.xlu1 %v1517_v44, %s1561_s22 }
 0x9ec   : > { %v1071_v49 = vpop.f32.mrf.mxu1  ;;  %v1025_v21 = vpop.f32.mrf.mxu0 }
 0x9ed   : > { %v1075_v50 = vadd.f32 %v1071_v49, %v1024_v47  ;;  %v1026_v22 = vadd.f32 %v1769_v45, %v1025_v21 }
 0x9ee   : > { %1082 = vrot.lane.b32.xlu1 %v1044_v48, %s1562_s24 }
 0x9ef   : > { %1518 = vtanh.f32 %v1075_v50  ;;  %v1076_v53 = vmul.f32 0.5, %v1075_v50 }
 0x9f1   : > { %1520 = vtanh.f32 %v1076_v53 }
 0x9f2   : > { %1522 = vtanh.f32 %v900_v54 }
 0x9f4   : > { %v1073_v51 = vpop.f32.mrf.mxu1 }
 0x9f5   : > { %v1519_v52 = vpop.eup %1518 }
 0x9f6   : > { %1087 = vrot.lane.b32.xlu2 %v1519_v52, %s1561_s22 }
 0x9f7   : > { %v1521_v55 = vpop.eup %1520 }
 0x9f8   : > { %v1078_v56 = vadd.f32 1.0, %v1521_v55  ;;  %v1523_v58 = vpop.eup %1522 }
 0x9f9   : > { %v902_v11 = vadd.f32 1.0, %v1523_v58 }
 0x9fa   : > { %v1079_v57 = vmul.f32 0.5, %v1078_v56 }
 0x9fb   : > { %v903_v61 = vmul.f32 0.5, %v902_v11 }
 0x9fd   : > { %v905_v5 = vmul.f32 %v903_v61, %v1736_v15 }
 0xa50   : > { %v1088_v59 = vpop.permute.xlu2 %1087 }
 0xa51   : > { %v1090_v60 = vmul.f32 %v1088_v59, %v1079_v57 }
 0xa53   : > { %1092 = vrot.lane.b32.xlu2 %v1090_v60, %s1562_s24 }
 0xa58   : > { %v908_v62 = vpop.permute.xlu1 %907 }
 0xa59   : > { %v910_v63 = vmul.f32 %v908_v62, %v903_v61 }
 0xa5b   : > { %912 = vrot.lane.b32.xlu0 %v910_v63, %s1562_s24 }
 0xa60   : > { %v1083_v0 = vpop.permute.xlu1 %1082 }
 0xa61   : > { %v1085_v1 = vmul.f32 %v1083_v0, %v1079_v57 }
 0xaad   : > { %v1093_v2 = vpop.permute.xlu2 %1092 }
 0xaae   : > { %v1095_v3 = vadd.f32 %v1093_v2, %v1085_v1 }
 0xab0   : > { %1524 = vtanh.f32 %v1095_v3 }
 0xab6   : > { %v1525_v4 = vpop.eup %1524 }
 0xab7   : > { %1098 = vrot.lane.b32.xlu1 %v1525_v4, %s1561_s22 }
 0xacd   : > { %v913_v6 = vpop.permute.xlu0 %912 }
 0xace   : > { %v915_v7 = vadd.f32 %v913_v6, %v905_v5 }
 0xad0   : > { %1526 = vtanh.f32 %v915_v7 }
 0xad6   : > { %v1527_v8 = vpop.eup %1526 }
 0xad7   : > { %918 = vrot.lane.b32.xlu0 %v1527_v8, %s1561_s22 }
 0xb29   : > { %v1099_v10 = vpop.permute.xlu1 %1098 }
 0xb2a   : > { %v1779_v12 = vmul.f32 %v1099_v10, %v1079_v57 }
 0xb2c   : > { %v1108_v13 = vpack.c.bf16 %v1779_v12, %v1779_v12 }
 0xb2e   : > { %1110 = vrot.lane.b32.xlu0 %v1108_v13, %s1562_s24 }
 0xb49   : > { %v919_v16 = vpop.permute.xlu0 %918 }
 0xb4a   : > { %v921_v17 = vmul.f32 %v919_v16, %v903_v61 }
 0xb4c   : > { %v928_v18 = vpack.c.bf16 %v921_v17, %v921_v17 }
 0xb4e   : > { %930 = vrot.lane.b32.xlu2 %v928_v18, %s1562_s24 }
 0xba0   : > { %v1111_v15 = vpop.permute.xlu0 %1110 }
 0xba1   : > { %1437 = vmatmul.msk.bf16.vlgmr.msrb.gmra.mxu2 %vm496_vm3, %v1111_v15 }
 0xba8   : > { %v931_v19 = vpop.permute.xlu2 %930 }
 0xba9   : > { %1417 = vmatmul.msk.bf16.vlgmr.msrb.gmra.mxu3 %vm496_vm3, %v931_v19 }
 0xc24   : > { %v1124_v23 = vpop.f32.mrf.mxu2 }
 0xc25   : > { %v1128_v24 = vadd.f32 %v1124_v23, %v1026_v22 }
 0xc27   : > { %1528 = vtanh.f32 %v1128_v24  ;;  %v1129_v32 = vmul.f32 0.5, %v1128_v24 }
 0xc2c   : > { %v944_v26 = vpop.f32.mrf.mxu3  ;;  %v1126_v27 = vpop.f32.mrf.mxu2 }
 0xc2d   : > { %v1529_v28 = vpop.eup %1528  ;;  %v948_v29 = vadd.f32 %v944_v26, %v753_v25 }
 0xc2e   : > { %1136 = vrot.lane.b32.xlu2 %v1529_v28, %s1561_s22 }
 0xc2f   : > { %1530 = vtanh.f32 %v948_v29  ;;  %v949_v14 = vmul.f32 0.5, %v948_v29 }
 0xc30   : > { %1532 = vtanh.f32 %v1129_v32 }
 0xc31   : > { %1534 = vtanh.f32 %v949_v14 }
 0xc34   : > { %v946_v30 = vpop.f32.mrf.mxu3 }
 0xc35   : > { %v1531_v31 = vpop.eup %1530 }
 0xc36   : > { %956 = vrot.lane.b32.xlu1 %v1531_v31, %s1561_s22  ;;  %v1533_v33 = vpop.eup %1532 }
 0xc37   : > { %v1131_v34 = vadd.f32 1.0, %v1533_v33  ;;  %v1535_v38 = vpop.eup %1534 }
 0xc38   : > { %v951_v39 = vadd.f32 1.0, %v1535_v38 }
 0xc39   : > { %v1132_v35 = vmul.f32 0.5, %v1131_v34  ;;  %v1462_v34 = vld [vmem:[%s1860_s10] sm:$0xff] }
 0xc3a   : > { %v952_v40 = vmul.f32 0.5, %v951_v39 }
 0xc3b   : > { %v1134_v43 = vmul.f32 %v1132_v35, %v1095_v3 }
 0xc3c   : > { %v954_v49 = vmul.f32 %v952_v40, %v915_v7 }
 0xc88   : > { %v1137_v36 = vpop.permute.xlu2 %1136 }
 0xc89   : > { %v1139_v37 = vmul.f32 %v1137_v36, %v1132_v35 }
 0xc8b   : > { %1141 = vrot.lane.b32.xlu1 %v1139_v37, %s1562_s24 }
 0xc93   : > { %923 = vrot.lane.b32.xlu1 %v921_v17, %s1562_s24 }
 0xca8   : > { %v957_v41 = vpop.permute.xlu1 %956 }
 0xca9   : > { %v959_v42 = vmul.f32 %v957_v41, %v952_v40 }
 0xcab   : > { %961 = vrot.lane.b32.xlu0 %v959_v42, %s1562_s24 }
 0xcfd   : > { %v1142_v44 = vpop.permute.xlu1 %1141 }
 0xcfe   : > { %v1144_v46 = vadd.f32 %v1142_v44, %v1134_v43 }
 0xd00   : > { %1536 = vtanh.f32 %v1144_v46 }
 0xd05   : > { %v924_v47 = vpop.permute.xlu1 %923 }
 0xd06   : > { %v1537_v48 = vpop.eup %1536  ;;  %926 = vst.msk [vmem:[#allocation2 + $0x10] sm:$0xff] %vm496_vm3, %v924_v47  ;;  %v1479_v47 = vld [vmem:[#allocation6] ss:$0 sm:$0xff] }
 0xd07   : > { %1147 = vrot.lane.b32.xlu0 %v1537_v48, %s1561_s22 }
 0xd0d   : > { %v984_v59 = vld [vmem:[#allocation2 + $0x10] sm:$0xff] }
 0xd1d   : > { %v962_v50 = vpop.permute.xlu0 %961 }
 0xd1e   : > { %v1796_v51 = vadd.f32 %v962_v50, %v954_v49 }
 0xd20   : > { %1538 = vtanh.f32 %v1796_v51 }
 0xd26   : > { %v1539_v52 = vpop.eup %1538 }
 0xd27   : > { %967 = vrot.lane.b32.xlu2 %v1539_v52, %s1561_s22 }
 0xd79   : > { %v1148_v53 = vpop.permute.xlu0 %1147 }
 0xd7a   : > { %v1150_v54 = vmul.f32 %v1148_v53, %v1132_v35 }
 0xd7c   : > { %v1157_v55 = vpack.c.bf16 %v1150_v54, %v1150_v54 }
 0xd7e   : > { %1159 = vrot.lane.b32.xlu0 %v1157_v55, %s1562_s24 }
 0xd81   : > { %v968_v56 = vpop.permute.xlu2 %967 }
 0xd82   : > { %v970_v57 = vmul.f32 %v968_v56, %v952_v40 }
 0xd84   : > { %972 = vrot.lane.b32.xlu2 %v970_v57, %s1562_s24 }
 0xdde   : > { %v973_v58 = vpop.permute.xlu2 %972 }
 0xddf   : > { %975 = vst.msk [vmem:[#allocation2 + $0x18] sm:$0xff] %vm496_vm3, %v973_v58 }
 0xde0   : > { %976 = vst.msk [vmem:[#allocation4 + $0x8] sm:$0xff] %vm496_vm3, %v973_v58 }
 0xde6   : > { %v985_v60 = vld [vmem:[#allocation2 + $0x18] sm:$0xff] }
 0xde7   : > { %v987_v11 = vpack.c.bf16 %v985_v60, %v984_v59 }
 0xde9   : > { %1427 = vmatmul.msk.bf16.gmra.mxu0 %vm496_vm3, %v987_v11 }
 0xdf0   : > { %v1160_v61 = vpop.permute.xlu0 %1159 }
 0xdf1   : > { %1438 = vmatmul.msk.bf16.vlgmr.msra.gmra.mxu3 %vm496_vm3, %v1160_v61 }
 0xe66   : > { %v1028_v62 = vpop.f32.mrf.mxu0 }
 0xe67   : > { %v1029_v63 = vadd.f32 %v1769_v45, %v1028_v62 }
 0xe6e   : > { %v1030_v22 = vpop.f32.mrf.mxu0 }
 0xe6f   : > { %v1031_v23 = vadd.f32 %v1769_v45, %v1030_v22 }
 0xe74   : > { %v1173_v0 = vpop.f32.mrf.mxu3 }
 0xe75   : > { %v1177_v1 = vadd.f32 %v1173_v0, %v1029_v63 }
 0xe77   : > { %1540 = vtanh.f32 %v1177_v1  ;;  %v1178_v4 = vmul.f32 0.5, %v1177_v1 }
 0xe79   : > { %1542 = vtanh.f32 %v1178_v4 }
 0xe7c   : > { %v1175_v2 = vpop.f32.mrf.mxu3 }
 0xe7d   : > { %v1541_v3 = vpop.eup %1540 }
 0xe7e   : > { %1185 = vrot.lane.b32.xlu1 %v1541_v3, %s1561_s22 }
 0xe7f   : > { %v1543_v5 = vpop.eup %1542 }
 0xe80   : > { %v1180_v6 = vadd.f32 1.0, %v1543_v5 }
 0xe82   : > { %v1181_v7 = vmul.f32 0.5, %v1180_v6 }
 0xe84   : > { %v1183_v13 = vmul.f32 %v1181_v7, %v1144_v46 }
 0xef0   : > { %v1186_v8 = vpop.permute.xlu1 %1185 }
 0xef1   : > { %v1188_v10 = vmul.f32 %v1186_v8, %v1181_v7 }
 0xef3   : > { %1190 = vrot.lane.b32.xlu2 %v1188_v10, %s1562_s24 }
 0xf4d   : > { %v1191_v16 = vpop.permute.xlu2 %1190 }
 0xf4e   : > { %v1193_v17 = vadd.f32 %v1191_v16, %v1183_v13 }
 0xf50   : > { %1544 = vtanh.f32 %v1193_v17 }
 0xf56   : > { %v1545_v18 = vpop.eup %1544 }
 0xf57   : > { %1196 = vrot.lane.b32.xlu0 %v1545_v18, %s1561_s22 }
 0xfc9   : > { %v1197_v15 = vpop.permute.xlu0 %1196 }
 0xfca   : > { %v1199_v19 = vmul.f32 %v1197_v15, %v1181_v7 }
 0xfcc   : > { %v1206_v20 = vpack.c.bf16 %v1199_v19, %v1199_v19 }
 0xfce   : > { %1208 = vrot.lane.b32.xlu1 %v1206_v20, %s1562_s24 }
0x1040   : > { %v1209_v21 = vpop.permute.xlu1 %1208 }
0x1041   : > { %1439 = vmatmul.msk.bf16.vlgmr.msra.gmra.mxu1 %vm496_vm3, %v1209_v21 }
0x10be   : > { %v1222_v24 = vpop.f32.mrf.mxu1 }
0x10bf   : > { %v1226_v25 = vadd.f32 %v1222_v24, %v1031_v23 }
0x10c1   : > { %1546 = vtanh.f32 %v1226_v25  ;;  %v1227_v28 = vmul.f32 0.5, %v1226_v25 }
0x10c3   : > { %1548 = vtanh.f32 %v1227_v28 }
0x10c6   : > { %v1224_v26 = vpop.f32.mrf.mxu1 }
0x10c7   : > { %v1547_v27 = vpop.eup %1546 }
0x10c8   : > { %1234 = vrot.lane.b32.xlu2 %v1547_v27, %s1561_s22 }
0x10c9   : > { %v1549_v29 = vpop.eup %1548 }
0x10ca   : > { %v1229_v30 = vadd.f32 1.0, %v1549_v29 }
0x10cc   : > { %v1230_v31 = vmul.f32 0.5, %v1229_v30 }
0x10ce   : > { %v1232_v35 = vmul.f32 %v1230_v31, %v1193_v17 }
0x10d0   : > { %1103 = vrot.lane.b32.xlu2 %v1779_v12, %s1562_s24  ;;  %v1463_v12 = vld [vmem:[%s1860_s10 + $0x8] sm:$0xff] }
0x10d1   : > { %1298 = vmatpush.bf16.msra.mxu2 %v1463_v12 }
0x10d5   : > { %1299 = vmatpush.bf16.msra.mxu2 %v1462_v34 }
0x1122   : > { %v1235_v32 = vpop.permute.xlu2 %1234 }
0x1123   : > { %v1237_v33 = vmul.f32 %v1235_v32, %v1230_v31 }
0x1125   : > { %1239 = vrot.lane.b32.xlu0 %v1237_v33, %s1562_s24 }
0x112a   : > { %v1104_v45 = vpop.permute.xlu2 %1103 }
0x112b   : > { %1106 = vst.msk [vmem:[#allocation2] sm:$0xff] %vm496_vm3, %v1104_v45 }
0x112d   : > { %1152 = vrot.lane.b32.xlu0 %v1150_v54, %s1562_s24 }
0x1132   : > { %v1260_v39 = vld [vmem:[#allocation2] sm:$0xff] }
0x1135   : > { %700 = vrot.lane.b32.xlu0 %v1732_v9, %s1563_s30 }
0x1197   : > { %v1240_v36 = vpop.permute.xlu0 %1239 }
0x1198   : > { %v1242_v37 = vadd.f32 %v1240_v36, %v1232_v35 }
0x119a   : > { %1550 = vtanh.f32 %v1242_v37 }
0x119f   : > { %v1153_v14 = vpop.permute.xlu0 %1152 }
0x11a0   : > { %v1551_v38 = vpop.eup %1550  ;;  %1155 = vst.msk [vmem:[#allocation2 + $0x8] sm:$0xff] %vm496_vm3, %v1153_v14 }
0x11a1   : > { %1245 = vrot.lane.b32.xlu1 %v1551_v38, %s1561_s22 }
0x11a7   : > { %v701_v9 = vpop.permute.xlu0 %700  ;;  %v1261_v40 = vld [vmem:[#allocation2 + $0x8] sm:$0xff] }
0x11a8   : > { %703 = vst.msk [vmem:[#allocation5] sm:$0xff] %vm496_vm3, %v701_v9  ;;  %v1264_v41 = vpack.c.bf16 %v1261_v40, %v1260_v39 }
0x11a9   : > { %1201 = vrot.lane.b32.xlu1 %v1199_v19, %s1562_s24 }
0x11aa   : > { %1448 = vmatmul.msk.bf16.vlgmr.msra.gmra.mxu2 %vm496_vm3, %v1264_v41 }
0x11b1   : > { %978 = vrot.lane.b32.xlu1 %v1796_v51, %s1563_s30 }
0x1213   : > { %v1246_v42 = vpop.permute.xlu1 %1245 }
0x1214   : > { %v1248_v43 = vmul.f32 %v1246_v42, %v1230_v31 }
0x1216   : > { %1250 = vrot.lane.b32.xlu2 %v1248_v43, %s1562_s24 }
0x121b   : > { %v1202_v44 = vpop.permute.xlu1 %1201 }
0x121c   : > { %1204 = vst.msk [vmem:[#allocation2 + $0x10] sm:$0xff] %vm496_vm3, %v1202_v44 }
0x121e   : > { %1256 = vrot.lane.b32.xlu2 %v1242_v37, %s1563_s30 }
0x1223   : > { %v979_v46 = vpop.permute.xlu1 %978  ;;  %v1262_v54 = vld [vmem:[#allocation2 + $0x10] sm:$0xff] }
0x1224   : > { %981 = vst.msk [vmem:[#allocation5 + $0x8] sm:$0xff] %vm496_vm3, %v979_v46 }
0x122d   : > { %v1301_v48 = vpop.f32.mrf.mxu2 }
0x122e   : > { %v1302_v49 = vadd.f32 %v1479_v47, %v1301_v48 }
0x1230   : > { %1312 = vst.msk [vmem:[%s1648_s13] sm:$0xff] %vm1311_vm4, %v1302_v49 }
0x1235   : > { %v1303_v50 = vpop.f32.mrf.mxu2 }
0x1236   : > { %v1304_v51 = vadd.f32 %v1479_v47, %v1303_v50 }
0x1238   : > { %1313 = vst.msk [vmem:[%s1648_s13 + $0x8] sm:$0xff] %vm1311_vm4, %v1304_v51 }
0x1270   : > { %v1251_v52 = vpop.permute.xlu2 %1250 }
0x1271   : > { %1253 = vst.msk [vmem:[#allocation2 + $0x18] sm:$0xff] %vm496_vm3, %v1251_v52 }
0x1272   : > { %1254 = vst.msk [vmem:[#allocation4 + $0x10] sm:$0xff] %vm496_vm3, %v1251_v52 }
0x1278   : > { %v1257_v53 = vpop.permute.xlu2 %1256  ;;  %v1263_v55 = vld [vmem:[#allocation2 + $0x18] sm:$0xff] }
0x1279   : > { %1259 = vst.msk [vmem:[#allocation5 + $0x10] sm:$0xff] %vm496_vm3, %v1257_v53  ;;  %v1265_v56 = vpack.c.bf16 %v1263_v55, %v1262_v54 }
0x127b   : > { %1449 = vmatmul.msk.bf16.gmra.mxu2 %vm496_vm3, %v1265_v56 }
0x12fe   : > { %v1306_v57 = vpop.f32.mrf.mxu2 }
0x12ff   : > { %v1307_v58 = vadd.f32 %v1479_v47, %v1306_v57 }
0x1301   : > { %1314 = vst.msk [vmem:[%s1648_s13 + $0x10] sm:$0xff] %vm1311_vm4, %v1307_v58 }
0x1306   : > { %v1308_v59 = vpop.f32.mrf.mxu2 }
0x1307   : > { %v1309_v60 = vadd.f32 %v1479_v47, %v1308_v59 }
0x1309   : > { %1315 = vst.msk [vmem:[%s1648_s13 + $0x18] sm:$0xff] %vm1311_vm4, %v1309_v60 }
0x130a PF: > { %s24_s23 = sadd.s32 1, %s1558_s23  }
0x130b   : > { %p21_p5 = scmp.ge.s32.totalorder %s24_s23, 4  }
0x130d   :  { %23 = sbr.rel (!%p21_p5) target bundleno = 3 (0x3), region = 112 }

</bundles_post_ra>
